<compile_context>
chip_gen: v7x
topology: tpu7x:2x2x1
jax: 0.10.0
libtpu: 0.0.40
codegen_flags: <defaults>
</compile_context>

<pallas_src>
import functools

import jax
import jax.numpy as jnp
from jax.experimental import pallas as pl
from jax.experimental.pallas import tpu as pltpu


def _mlstm_seq_kernel(x_ref, wx_ref, u_ref, b_ref, h_ref, c_ref, hcarry):
    """One time tile (T_TILE steps) of the MLSTM recurrence.

    x_ref  : (T_TILE, I)   input rows for this tile
    wx_ref : (I, 3H)       packed input-projection weights, cols [i | o | c]
    u_ref  : (H, 3H)       packed recurrent weights,        cols [i | o | c]
    b_ref  : (1, 3H)       packed biases (u-bias + w-bias per gate)
    h_ref  : (T_TILE, H)   output hidden states
    c_ref  : (T_TILE, H)   output memory cells
    hcarry : (1, H) VMEM   hidden state carried across grid steps
    """
    H = u_ref.shape[0]
    t_tile = x_ref.shape[0]

    # Step 0 of the whole sequence: hidden_state is None -> zeros.
    @pl.when(pl.program_id(0) == 0)
    def _():
        hcarry[...] = jnp.zeros_like(hcarry)

    # Batched input projection for the whole tile (fills MXU rows) + bias.
    # Gate order along the 3H axis: [i | o | c] (must match the slicing below).
    zx = (
        jnp.dot(x_ref[...], wx_ref[...], preferred_element_type=jnp.float32)
        + b_ref[...]
    )

    u = u_ref[...]  # hoisted: recurrent weights loaded once per tile
    h = hcarry[...]
    for t in range(t_tile):  # static, fully visible to the scheduler
        z = zx[t : t + 1, :] + jnp.dot(h, u, preferred_element_type=jnp.float32)
        i_gate = jax.nn.sigmoid(z[:, 0 * H : 1 * H])
        o_gate = jax.nn.sigmoid(z[:, 1 * H : 2 * H])
        c_tilde = jnp.tanh(z[:, 2 * H : 3 * H])
        c_new = i_gate * c_tilde
        h = o_gate * jnp.tanh(c_new)
        # Static-index row stores into the (8, 128) output blocks.
        h_ref[t : t + 1, :] = h.astype(h_ref.dtype)
        c_ref[t : t + 1, :] = c_new.astype(c_ref.dtype)

    hcarry[...] = h  # carry into the next grid step


def pack_mlstm_params(u_i, b_ui, w_i, b_wi,
                      u_o, b_uo, w_o, b_wo,
                      u_c, b_uc, w_c, b_wc,
                      dtype=jnp.float32):
    """Stack the live gates' weights ONCE at parameter-setup time.

    Inputs are in PyTorch nn.Linear layout: weight (out, in), bias (out,).
    The dead `d` gate is intentionally not packed.

    Returns:
      u  : (H, 3H)  recurrent weights, columns [i | o | c]
      wx : (I, 3H)  input weights,     columns [i | o | c]
      b  : (1, 3H)  summed biases per gate
    """
    u = jnp.concatenate([u_i.T, u_o.T, u_c.T], axis=1).astype(dtype)
    wx = jnp.concatenate([w_i.T, w_o.T, w_c.T], axis=1).astype(dtype)
    b = jnp.concatenate([b_ui + b_wi, b_uo + b_wo, b_uc + b_wc])[None, :]
    return u, wx, b.astype(jnp.float32)


@functools.partial(jax.jit, static_argnames=("t_tile",))
def mlstm_sequence(x_seq, u, wx, b, *, t_tile=8):
    """Run the MLSTM over a whole sequence in one pallas_call.

    x_seq: (T, I).  Returns (h_seq, c_seq), each (T, H); h_seq[t] / c_seq[t]
    are exactly what MLSTM.forward would return on its (t+1)-th call starting
    from a fresh module (hidden_state = memory_cell = None).
    """
    T, I = x_seq.shape
    H = u.shape[0]
    t_pad = ((T + t_tile - 1) // t_tile) * t_tile
    if t_pad != T:
        # Padded steps run after all real steps, so they never affect them.
        x_seq = jnp.pad(x_seq, ((0, t_pad - T), (0, 0)))

    h_seq, c_seq = pl.pallas_call(
        _mlstm_seq_kernel,
        out_shape=(
            jax.ShapeDtypeStruct((t_pad, H), x_seq.dtype),
            jax.ShapeDtypeStruct((t_pad, H), x_seq.dtype),
        ),
        grid_spec=pltpu.PrefetchScalarGridSpec(
            num_scalar_prefetch=0,
            grid=(t_pad // t_tile,),
            in_specs=[
                pl.BlockSpec((t_tile, I), lambda g: (g, 0)),       # x tile
                pl.BlockSpec((I, 3 * H), lambda g: (0, 0)),        # wx resident
                pl.BlockSpec((H, 3 * H), lambda g: (0, 0)),        # u  resident
                pl.BlockSpec((1, 3 * H), lambda g: (0, 0)),        # bias resident
            ],
            out_specs=[
                pl.BlockSpec((t_tile, H), lambda g: (g, 0)),       # h_seq
                pl.BlockSpec((t_tile, H), lambda g: (g, 0)),       # c_seq
            ],
            scratch_shapes=[pltpu.VMEM((1, H), jnp.float32)],      # carried h
        ),
        compiler_params=pltpu.CompilerParams(
            dimension_semantics=("arbitrary",),                    # sequential carry
        ),
    )(x_seq, wx, u, b)
    return h_seq[:T], c_seq[:T]


def _ref_sequence(x_seq, p):
    """Pure-JAX stepwise reference of the same math (independent of packing)."""
    H = p["u_i"].shape[0]
    hi = jax.lax.Precision.HIGHEST

    def lin(w, b, v):
        return jnp.dot(v, w.T, precision=hi) + b

    def step(h, x):
        i = jax.nn.sigmoid(lin(p["u_i"], p["b_ui"], h) + lin(p["w_i"], p["b_wi"], x))
        o = jax.nn.sigmoid(lin(p["u_o"], p["b_uo"], h) + lin(p["w_o"], p["b_wo"], x))
        ct = jnp.tanh(lin(p["u_c"], p["b_uc"], h) + lin(p["w_c"], p["b_wc"], x))
        c = i * ct
        h_new = o * jnp.tanh(c)
        return h_new, (h_new, c)

    h0 = jnp.zeros((H,), x_seq.dtype)
    _, (hs, cs) = jax.lax.scan(step, h0, x_seq)
    return hs, cs


if __name__ == "__main__":
    input_size = 64
    hidden_size = 128   # multiple of 128 -> gate slices / output blocks lane-aligned
    seq_len = 20        # not a multiple of T_TILE on purpose (exercises padding)

    key = jax.random.PRNGKey(0)
    keys = jax.random.split(key, 7)

    bu = 1.0 / jnp.sqrt(hidden_size)
    bw = 1.0 / jnp.sqrt(input_size)

    def u_lin(k):
        kw, kb = jax.random.split(k)
        return (jax.random.uniform(kw, (hidden_size, hidden_size), jnp.float32, -bu, bu),
                jax.random.uniform(kb, (hidden_size,), jnp.float32, -bu, bu))

    def w_lin(k):
        kw, kb = jax.random.split(k)
        return (jax.random.uniform(kw, (hidden_size, input_size), jnp.float32, -bw, bw),
                jax.random.uniform(kb, (hidden_size,), jnp.float32, -bw, bw))

    # Live gates i, o, c in PyTorch nn.Linear layout.  The d gate of the
    # original module never reaches the returned (h, c) and is dropped.
    u_i, b_ui = u_lin(keys[0]); w_i, b_wi = w_lin(keys[1])
    u_o, b_uo = u_lin(keys[2]); w_o, b_wo = w_lin(keys[3])
    u_c, b_uc = u_lin(keys[4]); w_c, b_wc = w_lin(keys[5])

    params = dict(u_i=u_i, b_ui=b_ui, w_i=w_i, b_wi=b_wi,
                  u_o=u_o, b_uo=b_uo, w_o=w_o, b_wo=b_wo,
                  u_c=u_c, b_uc=b_uc, w_c=w_c, b_wc=b_wc)

    u_pack, wx_pack, b_pack = pack_mlstm_params(
        u_i, b_ui, w_i, b_wi, u_o, b_uo, w_o, b_wo, u_c, b_uc, w_c, b_wc)

    x_seq = jax.random.normal(keys[6], (seq_len, input_size), jnp.float32)

    h_seq, c_seq = mlstm_sequence(x_seq, u_pack, wx_pack, b_pack)
    jax.block_until_ready((h_seq, c_seq))

    h_ref, c_ref = _ref_sequence(x_seq, params)

    assert h_seq.shape == (seq_len, hidden_size)
    assert c_seq.shape == (seq_len, hidden_size)
    assert jnp.allclose(h_seq, h_ref, atol=1e-4), "hidden_state sequence mismatch"
    assert jnp.allclose(c_seq, c_ref, atol=1e-4), "memory_cell sequence mismatch"

    print("KERNEL_OK")
</pallas_src>

<mosaic_0001>
module attributes {stable_mosaic.version = 11 : i64} {
  func.func @_mlstm_seq_kernel(%arg0: i32, %arg1: memref<8x64xf32, #tpu.memory_space<vmem>>, %arg2: memref<64x384xf32, #tpu.memory_space<vmem>>, %arg3: memref<128x384xf32, #tpu.memory_space<vmem>>, %arg4: memref<1x384xf32, #tpu.memory_space<vmem>>, %arg5: memref<8x128xf32, #tpu.memory_space<vmem>>, %arg6: memref<8x128xf32, #tpu.memory_space<vmem>>, %arg7: memref<1x128xf32, #tpu.memory_space<vmem>>) attributes {dimension_semantics = [#tpu.dimension_semantics<arbitrary>], iteration_bounds = array<i64: 3>, scalar_prefetch = 0 : i64, scratch_operands = 1 : i64, tpu.core_type = #tpu.core_type<tc>, window_params = [{transform_indices = @transform_0, window_bounds = array<i64: 8, 64>}, {pipeline_mode = #tpu.pipeline_mode<synchronous>, transform_indices = @transform_1, window_bounds = array<i64: 64, 384>}, {pipeline_mode = #tpu.pipeline_mode<synchronous>, transform_indices = @transform_2, window_bounds = array<i64: 128, 384>}, {pipeline_mode = #tpu.pipeline_mode<synchronous>, transform_indices = @transform_3, window_bounds = array<i64: 1, 384>}, {transform_indices = @transform_4, window_bounds = array<i64: 8, 128>}, {transform_indices = @transform_5, window_bounds = array<i64: 8, 128>}]} {
    %c0_i32 = arith.constant 0 : i32
    %0 = arith.cmpi eq, %arg0, %c0_i32 : i32
    %1 = arith.extui %0 : i1 to i32
    %c0_i32_0 = arith.constant 0 : i32
    %2 = arith.cmpi ne, %1, %c0_i32_0 : i32
    scf.if %2 {
      %cst_61 = arith.constant 0.000000e+00 : f32
      %188 = vector.broadcast %cst_61 : f32 to vector<1x128xf32>
      %c0_62 = arith.constant 0 : index
      %c0_63 = arith.constant 0 : index
      %189 = vector.load %arg7[%c0_62, %c0_63] : memref<1x128xf32, #tpu.memory_space<vmem>>, vector<1x128xf32>
      tpu.vector_store %arg7[%c0_62, %c0_63], %188 {strides = array<i32>} : memref<1x128xf32, #tpu.memory_space<vmem>>, vector<1x128xf32>,
    } else {
    }
    %c0 = arith.constant 0 : index
    %c0_1 = arith.constant 0 : index
    %3 = vector.load %arg1[%c0, %c0_1] : memref<8x64xf32, #tpu.memory_space<vmem>>, vector<8x64xf32>
    %c0_2 = arith.constant 0 : index
    %c0_3 = arith.constant 0 : index
    %4 = vector.load %arg2[%c0_2, %c0_3] : memref<64x384xf32, #tpu.memory_space<vmem>>, vector<64x384xf32>
    %cst = arith.constant dense<0.000000e+00> : vector<8x384xf32>
    %5 = tpu.matmul %3, %4, %cst {dimension_numbers = #tpu.dot_dimension_numbers<[1], [0], [0], [1], [0, 0, 1, 1], [], []>} : vector<8x64xf32>, vector<64x384xf32>, vector<8x384xf32> -> vector<8x384xf32>
    %c0_4 = arith.constant 0 : index
    %c0_5 = arith.constant 0 : index
    %6 = vector.load %arg4[%c0_4, %c0_5] : memref<1x384xf32, #tpu.memory_space<vmem>>, vector<1x384xf32>
    %7 = vector.broadcast %6 : vector<1x384xf32> to vector<8x384xf32>
    %8 = arith.addf %5, %7 : vector<8x384xf32>
    %c0_6 = arith.constant 0 : index
    %c0_7 = arith.constant 0 : index
    %9 = vector.load %arg3[%c0_6, %c0_7] : memref<128x384xf32, #tpu.memory_space<vmem>>, vector<128x384xf32>
    %c0_8 = arith.constant 0 : index
    %c0_9 = arith.constant 0 : index
    %10 = vector.load %arg7[%c0_8, %c0_9] : memref<1x128xf32, #tpu.memory_space<vmem>>, vector<1x128xf32>
    %11 = vector.extract_strided_slice %8 {offsets = [0, 0], sizes = [1, 384], strides = [1, 1]} : vector<8x384xf32> to vector<1x384xf32>
    %cst_10 = arith.constant dense<0.000000e+00> : vector<1x384xf32>
    %12 = tpu.matmul %10, %9, %cst_10 {dimension_numbers = #tpu.dot_dimension_numbers<[1], [0], [0], [1], [0, 0, 1, 1], [], []>} : vector<1x128xf32>, vector<128x384xf32>, vector<1x384xf32> -> vector<1x384xf32>
    %13 = arith.addf %11, %12 : vector<1x384xf32>
    %14 = vector.extract_strided_slice %13 {offsets = [0, 0], sizes = [1, 128], strides = [1, 1]} : vector<1x384xf32> to vector<1x128xf32>
    %15 = arith.negf %14 : vector<1x128xf32>
    %16 = math.exp %15 : vector<1x128xf32>
    %cst_11 = arith.constant 1.000000e+00 : f32
    %17 = vector.broadcast %cst_11 : f32 to vector<1x128xf32>
    %18 = arith.addf %17, %16 : vector<1x128xf32>
    %19 = arith.divf %17, %18 : vector<1x128xf32>
    %20 = vector.extract_strided_slice %13 {offsets = [0, 128], sizes = [1, 128], strides = [1, 1]} : vector<1x384xf32> to vector<1x128xf32>
    %21 = arith.negf %20 : vector<1x128xf32>
    %22 = math.exp %21 : vector<1x128xf32>
    %cst_12 = arith.constant 1.000000e+00 : f32
    %23 = vector.broadcast %cst_12 : f32 to vector<1x128xf32>
    %24 = arith.addf %23, %22 : vector<1x128xf32>
    %25 = arith.divf %23, %24 : vector<1x128xf32>
    %26 = vector.extract_strided_slice %13 {offsets = [0, 256], sizes = [1, 128], strides = [1, 1]} : vector<1x384xf32> to vector<1x128xf32>
    %27 = math.tanh %26 : vector<1x128xf32>
    %28 = arith.mulf %19, %27 : vector<1x128xf32>
    %29 = math.tanh %28 : vector<1x128xf32>
    %30 = arith.mulf %25, %29 : vector<1x128xf32>
    %c0_13 = arith.constant 0 : index
    %c0_14 = arith.constant 0 : index
    %31 = vector.load %arg5[%c0_13, %c0_14] : memref<8x128xf32, #tpu.memory_space<vmem>>, vector<1x128xf32>
    tpu.vector_store %arg5[%c0_13, %c0_14], %30 {strides = array<i32>} : memref<8x128xf32, #tpu.memory_space<vmem>>, vector<1x128xf32>,
    %c0_15 = arith.constant 0 : index
    %c0_16 = arith.constant 0 : index
    %32 = vector.load %arg6[%c0_15, %c0_16] : memref<8x128xf32, #tpu.memory_space<vmem>>, vector<1x128xf32>
    tpu.vector_store %arg6[%c0_15, %c0_16], %28 {strides = array<i32>} : memref<8x128xf32, #tpu.memory_space<vmem>>, vector<1x128xf32>,
    %33 = vector.extract_strided_slice %8 {offsets = [1, 0], sizes = [1, 384], strides = [1, 1]} : vector<8x384xf32> to vector<1x384xf32>
    %cst_17 = arith.constant dense<0.000000e+00> : vector<1x384xf32>
    %34 = tpu.matmul %30, %9, %cst_17 {dimension_numbers = #tpu.dot_dimension_numbers<[1], [0], [0], [1], [0, 0, 1, 1], [], []>} : vector<1x128xf32>, vector<128x384xf32>, vector<1x384xf32> -> vector<1x384xf32>
    %35 = arith.addf %33, %34 : vector<1x384xf32>
    %36 = vector.extract_strided_slice %35 {offsets = [0, 0], sizes = [1, 128], strides = [1, 1]} : vector<1x384xf32> to vector<1x128xf32>
    %37 = arith.negf %36 : vector<1x128xf32>
    %38 = math.exp %37 : vector<1x128xf32>
    %cst_18 = arith.constant 1.000000e+00 : f32
    %39 = vector.broadcast %cst_18 : f32 to vector<1x128xf32>
    %40 = arith.addf %39, %38 : vector<1x128xf32>
    %41 = arith.divf %39, %40 : vector<1x128xf32>
    %42 = vector.extract_strided_slice %35 {offsets = [0, 128], sizes = [1, 128], strides = [1, 1]} : vector<1x384xf32> to vector<1x128xf32>
    %43 = arith.negf %42 : vector<1x128xf32>
    %44 = math.exp %43 : vector<1x128xf32>
    %cst_19 = arith.constant 1.000000e+00 : f32
    %45 = vector.broadcast %cst_19 : f32 to vector<1x128xf32>
    %46 = arith.addf %45, %44 : vector<1x128xf32>
    %47 = arith.divf %45, %46 : vector<1x128xf32>
    %48 = vector.extract_strided_slice %35 {offsets = [0, 256], sizes = [1, 128], strides = [1, 1]} : vector<1x384xf32> to vector<1x128xf32>
    %49 = math.tanh %48 : vector<1x128xf32>
    %50 = arith.mulf %41, %49 : vector<1x128xf32>
    %51 = math.tanh %50 : vector<1x128xf32>
    %52 = arith.mulf %47, %51 : vector<1x128xf32>
    %c1 = arith.constant 1 : index
    %c0_20 = arith.constant 0 : index
    %53 = vector.load %arg5[%c1, %c0_20] : memref<8x128xf32, #tpu.memory_space<vmem>>, vector<1x128xf32>
    tpu.vector_store %arg5[%c1, %c0_20], %52 {strides = array<i32>} : memref<8x128xf32, #tpu.memory_space<vmem>>, vector<1x128xf32>,
    %c1_21 = arith.constant 1 : index
    %c0_22 = arith.constant 0 : index
    %54 = vector.load %arg6[%c1_21, %c0_22] : memref<8x128xf32, #tpu.memory_space<vmem>>, vector<1x128xf32>
    tpu.vector_store %arg6[%c1_21, %c0_22], %50 {strides = array<i32>} : memref<8x128xf32, #tpu.memory_space<vmem>>, vector<1x128xf32>,
    %55 = vector.extract_strided_slice %8 {offsets = [2, 0], sizes = [1, 384], strides = [1, 1]} : vector<8x384xf32> to vector<1x384xf32>
    %cst_23 = arith.constant dense<0.000000e+00> : vector<1x384xf32>
    %56 = tpu.matmul %52, %9, %cst_23 {dimension_numbers = #tpu.dot_dimension_numbers<[1], [0], [0], [1], [0, 0, 1, 1], [], []>} : vector<1x128xf32>, vector<128x384xf32>, vector<1x384xf32> -> vector<1x384xf32>
    %57 = arith.addf %55, %56 : vector<1x384xf32>
    %58 = vector.extract_strided_slice %57 {offsets = [0, 0], sizes = [1, 128], strides = [1, 1]} : vector<1x384xf32> to vector<1x128xf32>
    %59 = arith.negf %58 : vector<1x128xf32>
    %60 = math.exp %59 : vector<1x128xf32>
    %cst_24 = arith.constant 1.000000e+00 : f32
    %61 = vector.broadcast %cst_24 : f32 to vector<1x128xf32>
    %62 = arith.addf %61, %60 : vector<1x128xf32>
    %63 = arith.divf %61, %62 : vector<1x128xf32>
    %64 = vector.extract_strided_slice %57 {offsets = [0, 128], sizes = [1, 128], strides = [1, 1]} : vector<1x384xf32> to vector<1x128xf32>
    %65 = arith.negf %64 : vector<1x128xf32>
    %66 = math.exp %65 : vector<1x128xf32>
    %cst_25 = arith.constant 1.000000e+00 : f32
    %67 = vector.broadcast %cst_25 : f32 to vector<1x128xf32>
    %68 = arith.addf %67, %66 : vector<1x128xf32>
    %69 = arith.divf %67, %68 : vector<1x128xf32>
    %70 = vector.extract_strided_slice %57 {offsets = [0, 256], sizes = [1, 128], strides = [1, 1]} : vector<1x384xf32> to vector<1x128xf32>
    %71 = math.tanh %70 : vector<1x128xf32>
    %72 = arith.mulf %63, %71 : vector<1x128xf32>
    %73 = math.tanh %72 : vector<1x128xf32>
    %74 = arith.mulf %69, %73 : vector<1x128xf32>
    %c2 = arith.constant 2 : index
    %c0_26 = arith.constant 0 : index
    %75 = vector.load %arg5[%c2, %c0_26] : memref<8x128xf32, #tpu.memory_space<vmem>>, vector<1x128xf32>
    tpu.vector_store %arg5[%c2, %c0_26], %74 {strides = array<i32>} : memref<8x128xf32, #tpu.memory_space<vmem>>, vector<1x128xf32>,
    %c2_27 = arith.constant 2 : index
    %c0_28 = arith.constant 0 : index
    %76 = vector.load %arg6[%c2_27, %c0_28] : memref<8x128xf32, #tpu.memory_space<vmem>>, vector<1x128xf32>
    tpu.vector_store %arg6[%c2_27, %c0_28], %72 {strides = array<i32>} : memref<8x128xf32, #tpu.memory_space<vmem>>, vector<1x128xf32>,
    %77 = vector.extract_strided_slice %8 {offsets = [3, 0], sizes = [1, 384], strides = [1, 1]} : vector<8x384xf32> to vector<1x384xf32>
    %cst_29 = arith.constant dense<0.000000e+00> : vector<1x384xf32>
    %78 = tpu.matmul %74, %9, %cst_29 {dimension_numbers = #tpu.dot_dimension_numbers<[1], [0], [0], [1], [0, 0, 1, 1], [], []>} : vector<1x128xf32>, vector<128x384xf32>, vector<1x384xf32> -> vector<1x384xf32>
    %79 = arith.addf %77, %78 : vector<1x384xf32>
    %80 = vector.extract_strided_slice %79 {offsets = [0, 0], sizes = [1, 128], strides = [1, 1]} : vector<1x384xf32> to vector<1x128xf32>
    %81 = arith.negf %80 : vector<1x128xf32>
    %82 = math.exp %81 : vector<1x128xf32>
    %cst_30 = arith.constant 1.000000e+00 : f32
    %83 = vector.broadcast %cst_30 : f32 to vector<1x128xf32>
    %84 = arith.addf %83, %82 : vector<1x128xf32>
    %85 = arith.divf %83, %84 : vector<1x128xf32>
    %86 = vector.extract_strided_slice %79 {offsets = [0, 128], sizes = [1, 128], strides = [1, 1]} : vector<1x384xf32> to vector<1x128xf32>
    %87 = arith.negf %86 : vector<1x128xf32>
    %88 = math.exp %87 : vector<1x128xf32>
    %cst_31 = arith.constant 1.000000e+00 : f32
    %89 = vector.broadcast %cst_31 : f32 to vector<1x128xf32>
    %90 = arith.addf %89, %88 : vector<1x128xf32>
    %91 = arith.divf %89, %90 : vector<1x128xf32>
    %92 = vector.extract_strided_slice %79 {offsets = [0, 256], sizes = [1, 128], strides = [1, 1]} : vector<1x384xf32> to vector<1x128xf32>
    %93 = math.tanh %92 : vector<1x128xf32>
    %94 = arith.mulf %85, %93 : vector<1x128xf32>
    %95 = math.tanh %94 : vector<1x128xf32>
    %96 = arith.mulf %91, %95 : vector<1x128xf32>
    %c3 = arith.constant 3 : index
    %c0_32 = arith.constant 0 : index
    %97 = vector.load %arg5[%c3, %c0_32] : memref<8x128xf32, #tpu.memory_space<vmem>>, vector<1x128xf32>
    tpu.vector_store %arg5[%c3, %c0_32], %96 {strides = array<i32>} : memref<8x128xf32, #tpu.memory_space<vmem>>, vector<1x128xf32>,
    %c3_33 = arith.constant 3 : index
    %c0_34 = arith.constant 0 : index
    %98 = vector.load %arg6[%c3_33, %c0_34] : memref<8x128xf32, #tpu.memory_space<vmem>>, vector<1x128xf32>
    tpu.vector_store %arg6[%c3_33, %c0_34], %94 {strides = array<i32>} : memref<8x128xf32, #tpu.memory_space<vmem>>, vector<1x128xf32>,
    %99 = vector.extract_strided_slice %8 {offsets = [4, 0], sizes = [1, 384], strides = [1, 1]} : vector<8x384xf32> to vector<1x384xf32>
    %cst_35 = arith.constant dense<0.000000e+00> : vector<1x384xf32>
    %100 = tpu.matmul %96, %9, %cst_35 {dimension_numbers = #tpu.dot_dimension_numbers<[1], [0], [0], [1], [0, 0, 1, 1], [], []>} : vector<1x128xf32>, vector<128x384xf32>, vector<1x384xf32> -> vector<1x384xf32>
    %101 = arith.addf %99, %100 : vector<1x384xf32>
    %102 = vector.extract_strided_slice %101 {offsets = [0, 0], sizes = [1, 128], strides = [1, 1]} : vector<1x384xf32> to vector<1x128xf32>
    %103 = arith.negf %102 : vector<1x128xf32>
    %104 = math.exp %103 : vector<1x128xf32>
    %cst_36 = arith.constant 1.000000e+00 : f32
    %105 = vector.broadcast %cst_36 : f32 to vector<1x128xf32>
    %106 = arith.addf %105, %104 : vector<1x128xf32>
    %107 = arith.divf %105, %106 : vector<1x128xf32>
    %108 = vector.extract_strided_slice %101 {offsets = [0, 128], sizes = [1, 128], strides = [1, 1]} : vector<1x384xf32> to vector<1x128xf32>
    %109 = arith.negf %108 : vector<1x128xf32>
    %110 = math.exp %109 : vector<1x128xf32>
    %cst_37 = arith.constant 1.000000e+00 : f32
    %111 = vector.broadcast %cst_37 : f32 to vector<1x128xf32>
    %112 = arith.addf %111, %110 : vector<1x128xf32>
    %113 = arith.divf %111, %112 : vector<1x128xf32>
    %114 = vector.extract_strided_slice %101 {offsets = [0, 256], sizes = [1, 128], strides = [1, 1]} : vector<1x384xf32> to vector<1x128xf32>
    %115 = math.tanh %114 : vector<1x128xf32>
    %116 = arith.mulf %107, %115 : vector<1x128xf32>
    %117 = math.tanh %116 : vector<1x128xf32>
    %118 = arith.mulf %113, %117 : vector<1x128xf32>
    %c4 = arith.constant 4 : index
    %c0_38 = arith.constant 0 : index
    %119 = vector.load %arg5[%c4, %c0_38] : memref<8x128xf32, #tpu.memory_space<vmem>>, vector<1x128xf32>
    tpu.vector_store %arg5[%c4, %c0_38], %118 {strides = array<i32>} : memref<8x128xf32, #tpu.memory_space<vmem>>, vector<1x128xf32>,
    %c4_39 = arith.constant 4 : index
    %c0_40 = arith.constant 0 : index
    %120 = vector.load %arg6[%c4_39, %c0_40] : memref<8x128xf32, #tpu.memory_space<vmem>>, vector<1x128xf32>
    tpu.vector_store %arg6[%c4_39, %c0_40], %116 {strides = array<i32>} : memref<8x128xf32, #tpu.memory_space<vmem>>, vector<1x128xf32>,
    %121 = vector.extract_strided_slice %8 {offsets = [5, 0], sizes = [1, 384], strides = [1, 1]} : vector<8x384xf32> to vector<1x384xf32>
    %cst_41 = arith.constant dense<0.000000e+00> : vector<1x384xf32>
    %122 = tpu.matmul %118, %9, %cst_41 {dimension_numbers = #tpu.dot_dimension_numbers<[1], [0], [0], [1], [0, 0, 1, 1], [], []>} : vector<1x128xf32>, vector<128x384xf32>, vector<1x384xf32> -> vector<1x384xf32>
    %123 = arith.addf %121, %122 : vector<1x384xf32>
    %124 = vector.extract_strided_slice %123 {offsets = [0, 0], sizes = [1, 128], strides = [1, 1]} : vector<1x384xf32> to vector<1x128xf32>
    %125 = arith.negf %124 : vector<1x128xf32>
    %126 = math.exp %125 : vector<1x128xf32>
    %cst_42 = arith.constant 1.000000e+00 : f32
    %127 = vector.broadcast %cst_42 : f32 to vector<1x128xf32>
    %128 = arith.addf %127, %126 : vector<1x128xf32>
    %129 = arith.divf %127, %128 : vector<1x128xf32>
    %130 = vector.extract_strided_slice %123 {offsets = [0, 128], sizes = [1, 128], strides = [1, 1]} : vector<1x384xf32> to vector<1x128xf32>
    %131 = arith.negf %130 : vector<1x128xf32>
    %132 = math.exp %131 : vector<1x128xf32>
    %cst_43 = arith.constant 1.000000e+00 : f32
    %133 = vector.broadcast %cst_43 : f32 to vector<1x128xf32>
    %134 = arith.addf %133, %132 : vector<1x128xf32>
    %135 = arith.divf %133, %134 : vector<1x128xf32>
    %136 = vector.extract_strided_slice %123 {offsets = [0, 256], sizes = [1, 128], strides = [1, 1]} : vector<1x384xf32> to vector<1x128xf32>
    %137 = math.tanh %136 : vector<1x128xf32>
    %138 = arith.mulf %129, %137 : vector<1x128xf32>
    %139 = math.tanh %138 : vector<1x128xf32>
    %140 = arith.mulf %135, %139 : vector<1x128xf32>
    %c5 = arith.constant 5 : index
    %c0_44 = arith.constant 0 : index
    %141 = vector.load %arg5[%c5, %c0_44] : memref<8x128xf32, #tpu.memory_space<vmem>>, vector<1x128xf32>
    tpu.vector_store %arg5[%c5, %c0_44], %140 {strides = array<i32>} : memref<8x128xf32, #tpu.memory_space<vmem>>, vector<1x128xf32>,
    %c5_45 = arith.constant 5 : index
    %c0_46 = arith.constant 0 : index
    %142 = vector.load %arg6[%c5_45, %c0_46] : memref<8x128xf32, #tpu.memory_space<vmem>>, vector<1x128xf32>
    tpu.vector_store %arg6[%c5_45, %c0_46], %138 {strides = array<i32>} : memref<8x128xf32, #tpu.memory_space<vmem>>, vector<1x128xf32>,
    %143 = vector.extract_strided_slice %8 {offsets = [6, 0], sizes = [1, 384], strides = [1, 1]} : vector<8x384xf32> to vector<1x384xf32>
    %cst_47 = arith.constant dense<0.000000e+00> : vector<1x384xf32>
    %144 = tpu.matmul %140, %9, %cst_47 {dimension_numbers = #tpu.dot_dimension_numbers<[1], [0], [0], [1], [0, 0, 1, 1], [], []>} : vector<1x128xf32>, vector<128x384xf32>, vector<1x384xf32> -> vector<1x384xf32>
    %145 = arith.addf %143, %144 : vector<1x384xf32>
    %146 = vector.extract_strided_slice %145 {offsets = [0, 0], sizes = [1, 128], strides = [1, 1]} : vector<1x384xf32> to vector<1x128xf32>
    %147 = arith.negf %146 : vector<1x128xf32>
    %148 = math.exp %147 : vector<1x128xf32>
    %cst_48 = arith.constant 1.000000e+00 : f32
    %149 = vector.broadcast %cst_48 : f32 to vector<1x128xf32>
    %150 = arith.addf %149, %148 : vector<1x128xf32>
    %151 = arith.divf %149, %150 : vector<1x128xf32>
    %152 = vector.extract_strided_slice %145 {offsets = [0, 128], sizes = [1, 128], strides = [1, 1]} : vector<1x384xf32> to vector<1x128xf32>
    %153 = arith.negf %152 : vector<1x128xf32>
    %154 = math.exp %153 : vector<1x128xf32>
    %cst_49 = arith.constant 1.000000e+00 : f32
    %155 = vector.broadcast %cst_49 : f32 to vector<1x128xf32>
    %156 = arith.addf %155, %154 : vector<1x128xf32>
    %157 = arith.divf %155, %156 : vector<1x128xf32>
    %158 = vector.extract_strided_slice %145 {offsets = [0, 256], sizes = [1, 128], strides = [1, 1]} : vector<1x384xf32> to vector<1x128xf32>
    %159 = math.tanh %158 : vector<1x128xf32>
    %160 = arith.mulf %151, %159 : vector<1x128xf32>
    %161 = math.tanh %160 : vector<1x128xf32>
    %162 = arith.mulf %157, %161 : vector<1x128xf32>
    %c6 = arith.constant 6 : index
    %c0_50 = arith.constant 0 : index
    %163 = vector.load %arg5[%c6, %c0_50] : memref<8x128xf32, #tpu.memory_space<vmem>>, vector<1x128xf32>
    tpu.vector_store %arg5[%c6, %c0_50], %162 {strides = array<i32>} : memref<8x128xf32, #tpu.memory_space<vmem>>, vector<1x128xf32>,
    %c6_51 = arith.constant 6 : index
    %c0_52 = arith.constant 0 : index
    %164 = vector.load %arg6[%c6_51, %c0_52] : memref<8x128xf32, #tpu.memory_space<vmem>>, vector<1x128xf32>
    tpu.vector_store %arg6[%c6_51, %c0_52], %160 {strides = array<i32>} : memref<8x128xf32, #tpu.memory_space<vmem>>, vector<1x128xf32>,
    %165 = vector.extract_strided_slice %8 {offsets = [7, 0], sizes = [1, 384], strides = [1, 1]} : vector<8x384xf32> to vector<1x384xf32>
    %cst_53 = arith.constant dense<0.000000e+00> : vector<1x384xf32>
    %166 = tpu.matmul %162, %9, %cst_53 {dimension_numbers = #tpu.dot_dimension_numbers<[1], [0], [0], [1], [0, 0, 1, 1], [], []>} : vector<1x128xf32>, vector<128x384xf32>, vector<1x384xf32> -> vector<1x384xf32>
    %167 = arith.addf %165, %166 : vector<1x384xf32>
    %168 = vector.extract_strided_slice %167 {offsets = [0, 0], sizes = [1, 128], strides = [1, 1]} : vector<1x384xf32> to vector<1x128xf32>
    %169 = arith.negf %168 : vector<1x128xf32>
    %170 = math.exp %169 : vector<1x128xf32>
    %cst_54 = arith.constant 1.000000e+00 : f32
    %171 = vector.broadcast %cst_54 : f32 to vector<1x128xf32>
    %172 = arith.addf %171, %170 : vector<1x128xf32>
    %173 = arith.divf %171, %172 : vector<1x128xf32>
    %174 = vector.extract_strided_slice %167 {offsets = [0, 128], sizes = [1, 128], strides = [1, 1]} : vector<1x384xf32> to vector<1x128xf32>
    %175 = arith.negf %174 : vector<1x128xf32>
    %176 = math.exp %175 : vector<1x128xf32>
    %cst_55 = arith.constant 1.000000e+00 : f32
    %177 = vector.broadcast %cst_55 : f32 to vector<1x128xf32>
    %178 = arith.addf %177, %176 : vector<1x128xf32>
    %179 = arith.divf %177, %178 : vector<1x128xf32>
    %180 = vector.extract_strided_slice %167 {offsets = [0, 256], sizes = [1, 128], strides = [1, 1]} : vector<1x384xf32> to vector<1x128xf32>
    %181 = math.tanh %180 : vector<1x128xf32>
    %182 = arith.mulf %173, %181 : vector<1x128xf32>
    %183 = math.tanh %182 : vector<1x128xf32>
    %184 = arith.mulf %179, %183 : vector<1x128xf32>
    %c7 = arith.constant 7 : index
    %c0_56 = arith.constant 0 : index
    %185 = vector.load %arg5[%c7, %c0_56] : memref<8x128xf32, #tpu.memory_space<vmem>>, vector<1x128xf32>
    tpu.vector_store %arg5[%c7, %c0_56], %184 {strides = array<i32>} : memref<8x128xf32, #tpu.memory_space<vmem>>, vector<1x128xf32>,
    %c7_57 = arith.constant 7 : index
    %c0_58 = arith.constant 0 : index
    %186 = vector.load %arg6[%c7_57, %c0_58] : memref<8x128xf32, #tpu.memory_space<vmem>>, vector<1x128xf32>
    tpu.vector_store %arg6[%c7_57, %c0_58], %182 {strides = array<i32>} : memref<8x128xf32, #tpu.memory_space<vmem>>, vector<1x128xf32>,
    %c0_59 = arith.constant 0 : index
    %c0_60 = arith.constant 0 : index
    %187 = vector.load %arg7[%c0_59, %c0_60] : memref<1x128xf32, #tpu.memory_space<vmem>>, vector<1x128xf32>
    tpu.vector_store %arg7[%c0_59, %c0_60], %184 {strides = array<i32>} : memref<1x128xf32, #tpu.memory_space<vmem>>, vector<1x128xf32>,
    return
  }
  func.func @transform_0(%arg0: i32) -> (i32, i32) {
    %c0_i32 = arith.constant 0 : i32
    %c0_i32_0 = arith.constant 0 : i32
    return %arg0, %c0_i32 : i32, i32
  }
  func.func @transform_1(%arg0: i32) -> (i32, i32) {
    %c0_i32 = arith.constant 0 : i32
    %c0_i32_0 = arith.constant 0 : i32
    %c0_i32_1 = arith.constant 0 : i32
    return %c0_i32, %c0_i32_0 : i32, i32
  }
  func.func @transform_2(%arg0: i32) -> (i32, i32) {
    %c0_i32 = arith.constant 0 : i32
    %c0_i32_0 = arith.constant 0 : i32
    %c0_i32_1 = arith.constant 0 : i32
    return %c0_i32, %c0_i32_0 : i32, i32
  }
  func.func @transform_3(%arg0: i32) -> (i32, i32) {
    %c0_i32 = arith.constant 0 : i32
    %c0_i32_0 = arith.constant 0 : i32
    %c0_i32_1 = arith.constant 0 : i32
    return %c0_i32, %c0_i32_0 : i32, i32
  }
  func.func @transform_4(%arg0: i32) -> (i32, i32) {
    %c0_i32 = arith.constant 0 : i32
    %c0_i32_0 = arith.constant 0 : i32
    return %arg0, %c0_i32 : i32, i32
  }
  func.func @transform_5(%arg0: i32) -> (i32, i32) {
    %c0_i32 = arith.constant 0 : i32
    %c0_i32_0 = arith.constant 0 : i32
    return %arg0, %c0_i32 : i32, i32
  }
}

</mosaic_0001>

<bundles_post_ra>
// kernel: mlstm_sequence.1
= control target key start
LH: loop header
LB: loop body
LE: loop exit
PB: predicated region body
PF: predicated region fallthrough
CT: control target
= control target key end

     0   :  { %11 = vsyncpa [#allocation4], 0  ;;  %s3953_s0 = inlined_call_operand.vmem [shape: f32[24,64], index: 0, kind: input, shape index: {}]   ;;  %s3954_s1 = inlined_call_operand.hbm [shape: f32[64,384], index: 1, kind: input, shape index: {}]   ;;  %s3955_s2 = inlined_call_operand.hbm [shape: f32[128,384], index: 2, kind: input, shape index: {}]   ;;  %s3956_s3 = inlined_call_operand.vmem [shape: f32[1,384], index: 3, kind: input, shape index: {}]   ;;  %s3957_s4 = inlined_call_operand.hbm [shape: f32[24,128], index: 4, kind: output, shape index: {0}]   ;;  %s3958_s5 = inlined_call_operand.hbm [shape: f32[24,128], index: 5, kind: output, shape index: {1}]  }
   0x1   :  { %12 = vsyncpa [#allocation7], 0 }
   0x2   :  { %13 = vsyncpa [#allocation5], 0 }
   0x3   :  { %15 = vsyncpa [#allocation5 + $0x1], 0 }
   0x4   :  { %16 = vsyncpa [#allocation10], 0 }
   0x5   :  { %18 = vsyncpa [#allocation10 + $0x1], 0  ;;  %s3348_s18 = smov 0   ;;  %s3350_s19 = smov 0  }
   0x6   :  { %s3352_s20 = smov 0   ;;  %s3354_s21 = smov 0  }
   0x7 LB: > { %s3369_s22 = sadd.s32 4294967295, %s3306_s21   ;;  %s2025_s23 = sadd.s32 4294967294, %s3306_s21   ;;  %s3306_s21 = sphi %s3354_s21, %s3977_s21   ;;  %s3302_s20 = sphi %s3352_s20, %s3976_s20   ;;  %s3298_s19 = sphi %s3350_s19, %s3975_s19   ;;  %s3294_s18 = sphi %s3348_s18, %s3974_s18  }
   0x8   : > { %s3373_s24 = sadd.s32 1, %s3306_s21   ;;  %s120_s25 = sadd.s32 1, %s3302_s20 }
   0x9   : > { %s117_s26 = ssub.s32 %s3306_s21, %s3373_s24  ;;  %p130_p0 = scmp.ne.s32.totalorder %s3302_s20, %s3298_s19 }
   0xa   : > { %p118_p1 = scmp.eq.s32.totalorder %s117_s26, 0  ;;  %p131_p2 = scmp.eq.s32.totalorder %s3369_s22, 2 }
   0xb   : > { %p136_p3 = scmp.ne.s32.totalorder %s3298_s19, %s3294_s18  ;;  %p137_p4 = scmp.eq.s32.totalorder %s2025_s23, 2 }
   0xc   : > { %s3384_s27 = scalar_select %p118_p1, %s3302_s20, %s120_s25  }
   0xd   : > { %p3386_p5 = por %p131_p2, %p130_p0  ;;  %p3390_p6 = por %p137_p4, %p136_p3 }
   0xe   : > { %p2026_p7 = scmp.ge.s32.totalorder %s3306_s21, 1  ;;  %p170_p8 = scmp.lt.s32.totalorder %s3306_s21, 4 }
   0xf   : > { %s3962_s28 = scalar_select %p3386_p5, 1, 0 }
  0x10   : > { %s3963_s29 = scalar_select %p3390_p6, 1, 0 }
  0x11   : > { %p3959_p10 = scmp.eq.s32.totalorder %s3369_s22, 0  ;;  %p3398_p11 = pnand %p2026_p7, %p170_p8 }
  0x12   : > { %s3308_s6 = smov [#allocation3]   ;;  %s3309_s9 = smov [#allocation6]  }
  0x13   : > { %s3964_s30 = scalar_select %p3398_p11, 1, 0 }
  0x14   : > { %s182_s7 = sshll.u32 %s3308_s6, 4  ;;  %p2993_p12 = pneg %p3398_p11  ;;  %s183_s7 = int_to_ptr.vmem [resolvable:$true] %s182_s7 }
  0x15   : > { %s195_s10 = sshll.u32 %s3309_s9, 4  ;;  %s3148_s13 = scalar_lea.hbm %s3954_s1, 3072  ;;  %s3410_s10 = int_to_ptr.vmem [resolvable:$true] %s195_s10 }
  0x16   : > { %p3406_p13 = pnand %p3959_p10, %p2993_p12  ;;  %p3149_p0 = scmp.ne.s32.totalorder %s3954_s1, %s3148_s13 }
  0x17   : > { %p3155_p4 = scmp.lt.u32.totalorder %s3148_s13, %s3954_s1 }
  0x18   : > { %p3150_p1 = pneg %p3406_p13 }
  0x1a   : > { %p3151_p2 = pnand %p3150_p1, %p3149_p0 }
  0x1c   : > { %p3152_p3 = pneg %p3151_p2 }
  0x1e   : > { %p3157_p7 = pnand %p3155_p4, %p3152_p3 }
  0x20   : > { %3160 = shalt.err (!%p3157_p7)
}
  0x21   : > { %s3161_s23 = scalar_lea.vmem %s183_s7, 3072  ;;  %p3169_p10 = scmp.lt.s32.totalorder %s183_s7, %s183_s7 }
  0x22   : > { %p3162_p8 = scmp.ne.s32.totalorder %s183_s7, %s3161_s23  ;;  %p3170_p6 = scmp.lt.s32.totalorder %s3161_s23, %s3161_s23 }
  0x24   : > { %p3164_p12 = pnand %p3162_p8, %p3150_p1  ;;  %p3171_p5 = por %p3170_p6, %p3169_p10 }
  0x26   : > { %p3165_p9 = pneg %p3164_p12 }
  0x28   : > { %p3172_p11 = pnand %p3171_p5, %p3165_p9 }
  0x2a   : > { %3175 = shalt.err (!%p3172_p11)
}
  0x2b   : > { %s3310_s25 = smov 384   ;;  %s3311_s26 = smov 24  }
  0x2c   : > { %2996 = dma.hbm_to_vmem [thread:$0]  (!%p3406_p13), %s3954_s1, 3072, %s183_s7, [#allocation4], %s3310_s25, %s3310_s25, %s3311_s26  }
  0x2d   : > { %s3176_s13 = scalar_lea.hbm %s3955_s2, 6144 }
  0x2e   : > { %p3177_p0 = scmp.ne.s32.totalorder %s3955_s2, %s3176_s13  ;;  %p3183_p9 = scmp.lt.u32.totalorder %s3176_s13, %s3955_s2 }
  0x30   : > { %p3179_p5 = pnand %p3177_p0, %p3150_p1 }
  0x32   : > { %p3180_p6 = pneg %p3179_p5 }
  0x34   : > { %p3185_p10 = pnand %p3183_p9, %p3180_p6 }
  0x36   : > { %3188 = shalt.err (!%p3185_p10)
}
  0x37   : > { %s3189_s7 = scalar_lea.vmem %s3410_s10, 6144  ;;  %p3197_p4 = scmp.lt.s32.totalorder %s3410_s10, %s3410_s10 }
  0x38   : > { %p3190_p11 = scmp.ne.s32.totalorder %s3410_s10, %s3189_s7  ;;  %p3198_p7 = scmp.lt.s32.totalorder %s3189_s7, %s3189_s7 }
  0x3a   : > { %p3192_p2 = pnand %p3190_p11, %p3150_p1  ;;  %p3199_p8 = por %p3198_p7, %p3197_p4 }
  0x3c   : > { %p3193_p3 = pneg %p3192_p2 }
  0x3e   : > { %p3200_p12 = pnand %p3199_p8, %p3193_p3 }
  0x40   : > { %3203 = shalt.err (!%p3200_p12)
}
  0x41   : > { %2999 = dma.hbm_to_vmem [thread:$0]  (!%p3406_p13), %s3955_s2, 6144, %s3410_s10, [#allocation7], %s3310_s25, %s3310_s25, %s3311_s26  }
  0x42   : > { %p3966_p0 = scmp.ne.s32.totalorder %s3964_s30, 0 }
  0x43   : > { %p3967_p5 = scmp.eq.s32.totalorder (!%p3966_p0), %s3369_s22, 0 }
  0x44   : > { %221 = sbr.rel (%p3966_p0) target bundleno = 2233 (0x8b9), region = 36 }
  0x4b   : > { %3277 = dma.done.wait (%p3967_p5), [#allocation4], 3072   ;;  %p3968_p1 = pmov %p3967_p5 }
  0x4d   : > { %3279 = vsyncadd (%p3968_p1), [#allocation4], 4294964224  ;;  %p3969_p6 = pmov %p3968_p1 }
  0x4e   : > { %p3970_p9 = pmov %p3968_p1 }
  0x4f   : > { %3281 = dma.done.wait (%p3969_p6), [#allocation7], 6144  }
  0x50   : > { %3283 = vsyncadd (%p3970_p9), [#allocation7], 4294961152  ;;  %s3470_s8 = sand.u32 1, %s3298_s19   ;;  %p257_p13 = scmp.lt.s32.totalorder %s3369_s22, 2 }
  0x51   : > { %s2033_s30 = sshll.u32 %s3470_s8, 3  ;;  %p3971_p10 = scmp.ne.s32.totalorder %s3369_s22, 0 }
  0x52   : > { %s258_s10 = scalar_select %p257_p13, %s3369_s22, 2 }
  0x53   : > { %s3480_s12 = scalar_lea.vmem [#allocation8], %s2033_s30  ;;  %s3482_s13 = scalar_lea.vmem [#allocation9], %s2033_s30  ;;  %v3312_v0 = vmov (!%p3971_p10), 0.0  }
  0x54   : > { %s2035_s25 = sshll.u32 %s258_s10, 3  ;;  %264 = sbr.rel (%p3971_p10) target bundleno = 91 (0x5b), region = 48  ;;  %265 = vst [vmem:[#allocation2] sm:$0x1] (!%p3971_p10), %v3312_v0 }
  0x55   : > { %s3478_s11 = scalar_lea.vmem %s3953_s0, %s2035_s25 }
  0x5b PF: > { %v268_v1 = vld [vmem:[#allocation3 + $0x8] sm:$0xff]  ;;  %v271_v2 = vld [vmem:[#allocation3 + $0x20] sm:$0xff]  ;;  %v269_v3 = vld [vmem:[#allocation3 + $0x10] sm:$0xff]  ;;  %v3313_v4 = vmov 0.0|0.0   ;;  %v3314_v9 = vmov 0.0   ;;  %vm3315_vm0 = vmmov 0  }
  0x5c   : > { %2521 = vmatprep.subr.bf16.mxu1 %v3313_v4  ;;  %v2505_v5 = vpack.c.bf16 %v271_v2, %v268_v1  ;;  %v272_v6 = vld [vmem:[#allocation3 + $0x28] sm:$0xff]  ;;  %v267_v7 = vld [vmem:[#allocation3] sm:$0xff]  ;;  %v270_v8 = vld [vmem:[#allocation3 + $0x18] sm:$0xff]  ;;  %376 = vmatprep.mubr.f32.mxu0 %v3314_v9  ;;  %vm308_vm1 = vcmask 523264   ;;  %s2057_s16 = sshll.u32 %s3369_s22, 7  ;;  %s1912_s17 = sshll.u32 %s3482_s13, 4  ;;  %s3878_s17 = int_to_ptr.vmem [resolvable:$true] %s1912_s17 }
  0x5d   : > { %v2522_v10 = vpack.c.bf16 %v272_v6, %v269_v3  ;;  %v2507_v11 = vpack.c.bf16 %v270_v8, %v267_v7  ;;  %v274_v12 = vld [vmem:[#allocation3 + $0x38] sm:$0xff]  ;;  %v277_v13 = vld [vmem:[#allocation3 + $0x50] sm:$0xff]  ;;  %v275_v14 = vld [vmem:[#allocation3 + $0x40] sm:$0xff]  ;;  %2222 = vmatprep.mubr.msk.f32.mxu1 %vm3315_vm0, %v3314_v9  ;;  %s3876_s6 = scalar_lea.hbm %s3958_s5, %s2057_s16  ;;  %s1886_s30 = scalar_lea.sflag [#allocation10], %s3470_s8 }
  0x5e   : > { %2506 = vmatprep.subr.bf16.mxu0 %v2505_v5  ;;  %v2509_v15 = vpack.c.bf16 %v277_v13, %v274_v12  ;;  %v278_v16 = vld [vmem:[#allocation3 + $0x58] sm:$0xff]  ;;  %v273_v17 = vld [vmem:[#allocation3 + $0x30] sm:$0xff]  ;;  %v276_v18 = vld [vmem:[#allocation3 + $0x48] sm:$0xff]  ;;  %s3204_s10 = scalar_lea.vmem %s3878_s17, 128  ;;  %p3972_p2 = scmp.ne.s32.totalorder %s3962_s28, 0 }
  0x5f   : > { %2523 = vmatpush3.bf16.msra.mxu1 %v2522_v10  ;;  %2508 = vmatpush1.bf16.msra.mxu0 %v2507_v11  ;;  %v2525_v19 = vpack.c.bf16 %v278_v16, %v275_v14  ;;  %v2511_v20 = vpack.c.bf16 %v276_v18, %v273_v17  ;;  %v280_v21 = vld [vmem:[#allocation3 + $0x68] sm:$0xff]  ;;  %v283_v22 = vld [vmem:[#allocation3 + $0x80] sm:$0xff]  ;;  %v281_v23 = vld [vmem:[#allocation3 + $0x70] sm:$0xff]  ;;  %p3205_p11 = scmp.ne.s32.totalorder %s3878_s17, %s3204_s10  ;;  %s3316_s25 = smov [#allocation9]  }
  0x60   : > { %2524 = vmatprep.subr.bf16.mxu1 %v3313_v4  ;;  %2510 = vmatprep.subr.bf16.mxu0 %v2509_v15  ;;  %v2513_v24 = vpack.c.bf16 %v283_v22, %v280_v21  ;;  %v284_v25 = vld [vmem:[#allocation3 + $0x88] sm:$0xff]  ;;  %v279_v26 = vld [vmem:[#allocation3 + $0x60] sm:$0xff]  ;;  %v282_v27 = vld [vmem:[#allocation3 + $0x78] sm:$0xff]  ;;  %s3208_s26 = sshll.u32 %s3316_s25, 4  ;;  %s3209_s26 = int_to_ptr.vmem [resolvable:$false] %s3208_s26 }
  0x61   : > { %v286_v28 = vld [vmem:[#allocation3 + $0x98] sm:$0xff]  ;;  %v289_v29 = vld [vmem:[#allocation3 + $0xb0] sm:$0xff]  ;;  %v2528_v30 = vpack.c.bf16 %v284_v25, %v281_v23  ;;  %v2515_v31 = vpack.c.bf16 %v282_v27, %v279_v26  ;;  %v287_v32 = vld [vmem:[#allocation3 + $0xa0] sm:$0xff]  ;;  %p3206_p3 = pnand %p3205_p11, %p3972_p2  ;;  %s3210_s9 = scalar_lea.vmem %s3209_s26, 256 }
  0x62   : > { %v2517_v33 = vpack.c.bf16 %v289_v29, %v286_v28  ;;  %v290_v34 = vld [vmem:[#allocation3 + $0xb8] sm:$0xff]  ;;  %v285_v35 = vld [vmem:[#allocation3 + $0x90] sm:$0xff]  ;;  %v288_v36 = vld [vmem:[#allocation3 + $0xa8] sm:$0xff]  ;;  %p3211_p7 = scmp.lt.s32.totalorder %s3878_s17, %s3209_s26  ;;  %p3212_p8 = scmp.lt.s32.totalorder %s3210_s9, %s3204_s10 }
  0x63   : > { %2526 = vmatpush3.bf16.msra.mxu1 %v2525_v19  ;;  %2512 = vmatpush1.bf16.msra.mxu0 %v2511_v20  ;;  %v454_v37 = vld [vmem:[#allocation6 + $0x8] sm:$0xff]  ;;  %v457_v38 = vld [vmem:[#allocation6 + $0x20] sm:$0xff]  ;;  %v2531_v39 = vpack.c.bf16 %v290_v34, %v287_v32  ;;  %v2519_v40 = vpack.c.bf16 %v288_v36, %v285_v35  ;;  %v455_v41 = vld [vmem:[#allocation6 + $0x10] sm:$0xff]  ;;  %p3207_p4 = pneg %p3206_p3 }
  0x64   : > { %2527 = vmatprep.subr.bf16.mxu1 %v3313_v4  ;;  %2514 = vmatprep.subr.bf16.mxu0 %v2513_v24  ;;  %v3493_v42 = vpack.c.bf16 %v457_v38, %v454_v37  ;;  %v458_v43 = vld [vmem:[#allocation6 + $0x28] sm:$0xff]  ;;  %v453_v44 = vld [vmem:[#allocation6] sm:$0xff]  ;;  %v456_v45 = vld [vmem:[#allocation6 + $0x18] sm:$0xff]  ;;  %p3213_p12 = por %p3212_p8, %p3211_p7 }
  0x65   : > { %v460_v46 = vld [vmem:[#allocation6 + $0x38] sm:$0xff]  ;;  %v463_v47 = vld [vmem:[#allocation6 + $0x50] sm:$0xff]  ;;  %v266_v48 = vld [vmem:[%s3478_s11] sm:$0xff]  ;;  %v3496_v49 = vpack.c.bf16 %v458_v43, %v455_v41  ;;  %v3498_v50 = vpack.c.bf16 %v456_v45, %v453_v44 }
  0x66   : > { %v461_v51 = vld [vmem:[#allocation6 + $0x40] sm:$0xff]  ;;  %v3502_v52 = vpack.c.bf16 %v463_v47, %v460_v46  ;;  %v464_v53 = vld [vmem:[#allocation6 + $0x58] sm:$0xff]  ;;  %v459_v54 = vld [vmem:[#allocation6 + $0x30] sm:$0xff]  ;;  %p3214_p0 = pnand %p3213_p12, %p3207_p4 }
  0x67   : > { %2529 = vmatpush3.bf16.msra.mxu1 %v2528_v30  ;;  %2516 = vmatpush1.bf16.msra.mxu0 %v2515_v31  ;;  %v462_v55 = vld [vmem:[#allocation6 + $0x48] sm:$0xff]  ;;  %v469_v57 = vld [vmem:[#allocation6 + $0x80] sm:$0xff]  ;;  %v3506_v58 = vpack.c.bf16 %v464_v53, %v461_v51  ;;  %v467_v60 = vld [vmem:[#allocation6 + $0x70] sm:$0xff] }
  0x68   : > { %2530 = vmatprep.subr.bf16.mxu1 %v3313_v4  ;;  %2518 = vmatprep.subr.bf16.mxu0 %v2517_v33  ;;  %v466_v56 = vld [vmem:[#allocation6 + $0x68] sm:$0xff]  ;;  %v3508_v59 = vpack.c.bf16 %v462_v55, %v459_v54  ;;  %v465_v63 = vld [vmem:[#allocation6 + $0x60] sm:$0xff]  ;;  %v468_v0 = vld [vmem:[#allocation6 + $0x78] sm:$0xff] }
  0x69   : > { %v3512_v61 = vpack.c.bf16 %v469_v57, %v466_v56  ;;  %v470_v62 = vld [vmem:[#allocation6 + $0x88] sm:$0xff]  ;;  %v472_v1 = vld [vmem:[#allocation6 + $0x98] sm:$0xff]  ;;  %v475_v2 = vld [vmem:[#allocation6 + $0xb0] sm:$0xff]  ;;  %v3521_v5 = vpack.c.bf16 %v468_v0, %v465_v63 }
  0x6a   : > { %v3519_v3 = vpack.c.bf16 %v470_v62, %v467_v60  ;;  %v473_v6 = vld [vmem:[#allocation6 + $0xa0] sm:$0xff]  ;;  %v3525_v7 = vpack.c.bf16 %v475_v2, %v472_v1  ;;  %v476_v8 = vld [vmem:[#allocation6 + $0xb8] sm:$0xff]  ;;  %v471_v10 = vld [vmem:[#allocation6 + $0x90] sm:$0xff]  ;;  %v293_v62 = vlaneseq }
  0x6b   : > { %2532 = vmatpush3.bf16.msra.mxu1 %v2531_v39  ;;  %2520 = vmatpush1.bf16.msra.mxu0 %v2519_v40  ;;  %v474_v11 = vld [vmem:[#allocation6 + $0xa8] sm:$0xff]  ;;  %v481_v13 = vld [vmem:[#allocation6 + $0xe0] sm:$0xff]  ;;  %v3529_v14 = vpack.c.bf16 %v476_v8, %v473_v6  ;;  %v479_v16 = vld [vmem:[#allocation6 + $0xd0] sm:$0xff] }
  0x6c   : > { %2565 = vmatprep.subr.bf16.mxu1 %v3313_v4  ;;  %2534 = vmatprep.subr.bf16.mxu0 %v3493_v42  ;;  %v478_v12 = vld [vmem:[#allocation6 + $0xc8] sm:$0xff]  ;;  %v3531_v15 = vpack.c.bf16 %v474_v11, %v471_v10  ;;  %v477_v19 = vld [vmem:[#allocation6 + $0xc0] sm:$0xff]  ;;  %v480_v20 = vld [vmem:[#allocation6 + $0xd8] sm:$0xff]  ;;  %v294_v63 = vshrl.u32 %v293_v62, 7 }
  0x6d   : > { %v3535_v17 = vpack.c.bf16 %v481_v13, %v478_v12  ;;  %v482_v18 = vld [vmem:[#allocation6 + $0xe8] sm:$0xff]  ;;  %v484_v21 = vld [vmem:[#allocation6 + $0xf8] sm:$0xff]  ;;  %v487_v22 = vld [vmem:[#allocation6 + $0x110] sm:$0xff]  ;;  %v3541_v24 = vpack.c.bf16 %v480_v20, %v477_v19 }
  0x6e   : > { %2037 = vmatmul.mubr.msk.f32.vlgmr.msra.gmra.mrb[0].mxu0 %vm308_vm1, %v266_v48  ;;  %2223 = vmatmul.mubr.msk.f32.vlgmr.msra.gmra.mrb[0].mxu1 %vm308_vm1, %v266_v48  ;;  %v3539_v23 = vpack.c.bf16 %v482_v18, %v479_v16  ;;  %v485_v25 = vld [vmem:[#allocation6 + $0x100] sm:$0xff]  ;;  %v3545_v26 = vpack.c.bf16 %v487_v22, %v484_v21  ;;  %v488_v27 = vld [vmem:[#allocation6 + $0x118] sm:$0xff]  ;;  %v483_v28 = vld [vmem:[#allocation6 + $0xf0] sm:$0xff]  ;;  %v295_v0 = vsub.s32 0, %v294_v63  ;;  %v299_v6 = vsub.s32 1, %v294_v63 }
  0x6f   : > { %2567 = vmatpush3.bf16.msra.mxu1 %v3496_v49  ;;  %2536 = vmatpush1.bf16.msra.mxu0 %v3498_v50  ;;  %v486_v29 = vld [vmem:[#allocation6 + $0x108] sm:$0xff]  ;;  %v493_v31 = vld [vmem:[#allocation6 + $0x140] sm:$0xff]  ;;  %v3549_v32 = vpack.c.bf16 %v488_v27, %v485_v25  ;;  %v491_v34 = vld [vmem:[#allocation6 + $0x130] sm:$0xff]  ;;  %v303_v20 = vsub.s32 2, %v294_v63 }
  0x70   : > { %2568 = vmatprep.subr.bf16.mxu1 %v3313_v4  ;;  %2538 = vmatprep.subr.bf16.mxu0 %v3502_v52  ;;  %v490_v30 = vld [vmem:[#allocation6 + $0x128] sm:$0xff]  ;;  %v3551_v33 = vpack.c.bf16 %v486_v29, %v483_v28  ;;  %v489_v37 = vld [vmem:[#allocation6 + $0x120] sm:$0xff]  ;;  %v492_v38 = vld [vmem:[#allocation6 + $0x138] sm:$0xff] }
  0x71   : > { %2257 = vmatprep.mubr.msk.f32.mxu1 %vm3315_vm0, %v3314_v9  ;;  %566 = vmatprep.mubr.f32.mxu0 %v3314_v9  ;;  %v3555_v35 = vpack.c.bf16 %v493_v31, %v490_v30  ;;  %v494_v36 = vld [vmem:[#allocation6 + $0x148] sm:$0xff]  ;;  %v496_v39 = vld [vmem:[#allocation6 + $0x158] sm:$0xff]  ;;  %v499_v40 = vld [vmem:[#allocation6 + $0x170] sm:$0xff]  ;;  %v3561_v43 = vpack.c.bf16 %v492_v38, %v489_v37 }
  0x72   : > { %v3559_v41 = vpack.c.bf16 %v494_v36, %v491_v34  ;;  %v497_v44 = vld [vmem:[#allocation6 + $0x160] sm:$0xff]  ;;  %v3565_v45 = vpack.c.bf16 %v499_v40, %v496_v39  ;;  %v500_v46 = vld [vmem:[#allocation6 + $0x178] sm:$0xff]  ;;  %v495_v47 = vld [vmem:[#allocation6 + $0x150] sm:$0xff] }
  0x73   : > { %2570 = vmatpush3.bf16.msra.mxu1 %v3506_v58  ;;  %2540 = vmatpush1.bf16.msra.mxu0 %v3508_v59  ;;  %v498_v48 = vld [vmem:[#allocation6 + $0x168] sm:$0xff]  ;;  %v3569_v51 = vpack.c.bf16 %v500_v46, %v497_v44  ;;  %v501_v54 = vld [vmem:[#allocation2] sm:$0x1] }
  0x74   : > { %2571 = vmatprep.subr.bf16.mxu1 %v3313_v4  ;;  %2542 = vmatprep.subr.bf16.mxu0 %v3512_v61  ;;  %v3571_v53 = vpack.c.bf16 %v498_v48, %v495_v47  ;;  %v291_v1 = vld [vmem:[%s3956_s3] sm:$0x7] }
  0x75   : > { %v296_v2 = vrot.slane %v291_v1, %v295_v0  ;;  %v300_v10 = vrot.slane %v291_v1, %v299_v6  ;;  %v304_v25 = vrot.slane %v291_v1, %v303_v20 }
  0x77   : > { %2573 = vmatpush3.bf16.msra.mxu1 %v3519_v3  ;;  %2544 = vmatpush1.bf16.msra.mxu0 %v3521_v5 }
  0x78   : > { %2574 = vmatprep.subr.bf16.mxu1 %v3313_v4  ;;  %2546 = vmatprep.subr.bf16.mxu0 %v3525_v7 }
  0x7b   : > { %2576 = vmatpush3.bf16.msra.mxu1 %v3529_v14  ;;  %2548 = vmatpush1.bf16.msra.mxu0 %v3531_v15 }
  0x7c   : > { %2577 = vmatprep.subr.bf16.mxu1 %v3313_v4  ;;  %2550 = vmatprep.subr.bf16.mxu0 %v3535_v17 }
  0x7f   : > { %2579 = vmatpush3.bf16.msra.mxu1 %v3539_v23  ;;  %2552 = vmatpush1.bf16.msra.mxu0 %v3541_v24 }
  0x80   : > { %2580 = vmatprep.subr.bf16.mxu1 %v3313_v4  ;;  %2554 = vmatprep.subr.bf16.mxu0 %v3545_v26 }
  0x83   : > { %2582 = vmatpush3.bf16.msra.mxu1 %v3549_v32  ;;  %2556 = vmatpush1.bf16.msra.mxu0 %v3551_v33 }
  0x84   : > { %2583 = vmatprep.subr.bf16.mxu1 %v3313_v4  ;;  %2558 = vmatprep.subr.bf16.mxu0 %v3555_v35 }
  0x87   : > { %2585 = vmatpush3.bf16.msra.mxu1 %v3559_v41  ;;  %2560 = vmatpush1.bf16.msra.mxu0 %v3561_v43 }
  0x88   : > { %2586 = vmatprep.subr.bf16.mxu1 %v3313_v4  ;;  %2562 = vmatprep.subr.bf16.mxu0 %v3565_v45 }
  0x8b   : > { %2588 = vmatpush3.bf16.msra.mxu1 %v3569_v51  ;;  %2564 = vmatpush1.bf16.msra.mxu0 %v3571_v53 }
  0x8c   : > { %2590 = vmatprep.subr.bf16.mxu0 %v3493_v42  ;;  %2621 = vmatprep.subr.bf16.mxu1 %v3313_v4 }
  0x8e   : > { %2258 = vmatmul.mubr.f32.vlgmr.msra.gmra.mrb[2].mxu1 %v501_v54  ;;  %567 = vmatmul.mubr.f32.vlgmr.msra.gmra.mrb[2].mxu0 %v501_v54 }
  0x8f   : > { %2592 = vmatpush1.bf16.msra.mxu0 %v3498_v50  ;;  %2623 = vmatpush3.bf16.msra.mxu1 %v3496_v49 }
  0x90   : > { %2594 = vmatprep.subr.bf16.mxu0 %v3502_v52  ;;  %2624 = vmatprep.subr.bf16.mxu1 %v3313_v4 }
  0x91   : > { %728 = vmatprep.mubr.f32.mxu0 %v3314_v9  ;;  %2292 = vmatprep.mubr.msk.f32.mxu1 %vm3315_vm0, %v3314_v9 }
  0x93   : > { %2596 = vmatpush1.bf16.msra.mxu0 %v3508_v59  ;;  %2626 = vmatpush3.bf16.msra.mxu1 %v3506_v58 }
  0x94   : > { %2598 = vmatprep.subr.bf16.mxu0 %v3512_v61  ;;  %2627 = vmatprep.subr.bf16.mxu1 %v3313_v4 }
  0x97   : > { %2600 = vmatpush1.bf16.msra.mxu0 %v3521_v5  ;;  %2629 = vmatpush3.bf16.msra.mxu1 %v3519_v3 }
  0x98   : > { %2602 = vmatprep.subr.bf16.mxu0 %v3525_v7  ;;  %2630 = vmatprep.subr.bf16.mxu1 %v3313_v4 }
  0x9b   : > { %2604 = vmatpush1.bf16.msra.mxu0 %v3531_v15  ;;  %2632 = vmatpush3.bf16.msra.mxu1 %v3529_v14 }
  0x9c   : > { %2606 = vmatprep.subr.bf16.mxu0 %v3535_v17  ;;  %2633 = vmatprep.subr.bf16.mxu1 %v3313_v4 }
  0x9f   : > { %2608 = vmatpush1.bf16.msra.mxu0 %v3541_v24  ;;  %2635 = vmatpush3.bf16.msra.mxu1 %v3539_v23 }
  0xa0   : > { %2610 = vmatprep.subr.bf16.mxu0 %v3545_v26  ;;  %2636 = vmatprep.subr.bf16.mxu1 %v3313_v4 }
  0xa3   : > { %2612 = vmatpush1.bf16.msra.mxu0 %v3551_v33  ;;  %2638 = vmatpush3.bf16.msra.mxu1 %v3549_v32 }
  0xa4   : > { %2614 = vmatprep.subr.bf16.mxu0 %v3555_v35  ;;  %2639 = vmatprep.subr.bf16.mxu1 %v3313_v4 }
  0xa7   : > { %2616 = vmatpush1.bf16.msra.mxu0 %v3561_v43  ;;  %2641 = vmatpush3.bf16.msra.mxu1 %v3559_v41 }
  0xa8   : > { %2618 = vmatprep.subr.bf16.mxu0 %v3565_v45  ;;  %2642 = vmatprep.subr.bf16.mxu1 %v3313_v4 }
  0xab   : > { %2620 = vmatpush1.bf16.msra.mxu0 %v3571_v53  ;;  %2644 = vmatpush3.bf16.msra.mxu1 %v3569_v51 }
  0xac   : > { %2646 = vmatprep.subr.bf16.mxu0 %v3493_v42  ;;  %2677 = vmatprep.subr.bf16.mxu1 %v3313_v4 }
 0x141   : > { %v378_v55 = vpop.f32.mrb[0].mxu0  ;;  %v449_v56 = vpop.f32.mrb[0].mxu1 }
 0x142   : > { %v380_v57 = vpop.f32.mrb[1].mxu0  ;;  %v2224_v60 = vpop.f32.mrb[1].mxu1  ;;  %v3617_v8 = vadd.f32 %v378_v55, %v296_v2  ;;  %v3623_v28 = vadd.f32 %v449_v56, %v304_v25 }
 0x143   : > { %v3620_v19 = vadd.f32 %v380_v57, %v300_v10 }
 0x161   : > { %v639_v11 = vpop.f32.mrb[2].mxu1  ;;  %v568_v12 = vpop.f32.mrb[2].mxu0 }
 0x162   : > { %v643_v13 = vadd.f32 %v568_v12, %v3617_v8  ;;  %v570_v16 = vpop.f32.mrb[3].mxu0  ;;  %v2259_v18 = vpop.f32.mrb[3].mxu1  ;;  %v645_v29 = vadd.f32 %v639_v11, %v3623_v28 }
 0x163   : > { %v644_v22 = vadd.f32 %v570_v16, %v3620_v19 }
 0x164   : > { %v2039_v21 = vmul.f32 -1.442695, %v643_v13 }
 0x165   : > { %v2040_v27 = vmul.f32 -1.442695, %v644_v22 }
 0x166   : > { %3052 = vpow2.f32 %v2039_v21 }
 0x167   : > { %3054 = vpow2.f32 %v2040_v27 }
 0x168   : > { %3056 = vtanh.f32 %v645_v29 }
 0x170   : > { %v3053_v30 = vpop.eup %3052 }
 0x171   : > { %v649_v31 = vadd.f32 1.0, %v3053_v30  ;;  %v3055_v34 = vpop.eup %3054 }
 0x172   : > { %v655_v36 = vadd.f32 1.0, %v3055_v34  ;;  %v3057_v37 = vpop.eup %3056 }
 0x173   : > { %3058 = vrcp.f32 %v649_v31 }
 0x174   : > { %3060 = vrcp.f32 %v655_v36 }
 0x17d   : > { %v3059_v38 = vpop.eup %3058 }
 0x17e   : > { %v659_v39 = vmul.f32 %v3059_v38, %v3057_v37  ;;  %v3061_v40 = vpop.eup %3060 }
 0x180   : > { %3062 = vtanh.f32 %v659_v39  ;;  %663 = vst [vmem:[%s3482_s13] sm:$0x1] %v659_v39 }
 0x18a   : > { %v3063_v44 = vpop.eup %3062 }
 0x18b   : > { %v661_v46 = vmul.f32 %v3063_v44, %v3061_v40 }
 0x18d   : > { %662 = vst [vmem:[%s3480_s12] sm:$0x1] %v661_v46  ;;  %729 = vmatmul.mubr.f32.vlgmr.msra.gmra.mrb[4].mxu0 %v661_v46  ;;  %2293 = vmatmul.mubr.f32.vlgmr.msra.gmra.mrb[4].mxu1 %v661_v46 }
 0x18e   : > { %2648 = vmatpush1.bf16.msra.mxu0 %v3498_v50  ;;  %2679 = vmatpush3.bf16.msra.mxu1 %v3496_v49 }
 0x18f   : > { %2650 = vmatprep.subr.bf16.mxu0 %v3502_v52  ;;  %2680 = vmatprep.subr.bf16.mxu1 %v3313_v4 }
 0x190   : > { %902 = vmatprep.mubr.f32.mxu0 %v3314_v9  ;;  %2327 = vmatprep.mubr.msk.f32.mxu1 %vm3315_vm0, %v3314_v9 }
 0x192   : > { %2652 = vmatpush1.bf16.msra.mxu0 %v3508_v59  ;;  %2682 = vmatpush3.bf16.msra.mxu1 %v3506_v58 }
 0x193   : > { %2654 = vmatprep.subr.bf16.mxu0 %v3512_v61  ;;  %2683 = vmatprep.subr.bf16.mxu1 %v3313_v4 }
 0x196   : > { %2656 = vmatpush1.bf16.msra.mxu0 %v3521_v5  ;;  %2685 = vmatpush3.bf16.msra.mxu1 %v3519_v3 }
 0x197   : > { %2658 = vmatprep.subr.bf16.mxu0 %v3525_v7  ;;  %2686 = vmatprep.subr.bf16.mxu1 %v3313_v4 }
 0x19a   : > { %2660 = vmatpush1.bf16.msra.mxu0 %v3531_v15  ;;  %2688 = vmatpush3.bf16.msra.mxu1 %v3529_v14 }
 0x19b   : > { %2662 = vmatprep.subr.bf16.mxu0 %v3535_v17  ;;  %2689 = vmatprep.subr.bf16.mxu1 %v3313_v4 }
 0x19e   : > { %2664 = vmatpush1.bf16.msra.mxu0 %v3541_v24  ;;  %2691 = vmatpush3.bf16.msra.mxu1 %v3539_v23 }
 0x19f   : > { %2666 = vmatprep.subr.bf16.mxu0 %v3545_v26  ;;  %2692 = vmatprep.subr.bf16.mxu1 %v3313_v4 }
 0x1a2   : > { %2668 = vmatpush1.bf16.msra.mxu0 %v3551_v33  ;;  %2694 = vmatpush3.bf16.msra.mxu1 %v3549_v32 }
 0x1a3   : > { %2670 = vmatprep.subr.bf16.mxu0 %v3555_v35  ;;  %2695 = vmatprep.subr.bf16.mxu1 %v3313_v4 }
 0x1a6   : > { %2672 = vmatpush1.bf16.msra.mxu0 %v3561_v43  ;;  %2697 = vmatpush3.bf16.msra.mxu1 %v3559_v41 }
 0x1a7   : > { %2674 = vmatprep.subr.bf16.mxu0 %v3565_v45  ;;  %2698 = vmatprep.subr.bf16.mxu1 %v3313_v4 }
 0x1aa   : > { %2676 = vmatpush1.bf16.msra.mxu0 %v3571_v53  ;;  %2700 = vmatpush3.bf16.msra.mxu1 %v3569_v51 }
 0x1ab   : > { %2702 = vmatprep.subr.bf16.mxu0 %v3493_v42  ;;  %2733 = vmatprep.subr.bf16.mxu1 %v3313_v4 }
 0x260   : > { %v730_v47 = vpop.f32.mrb[4].mxu0  ;;  %v801_v48 = vpop.f32.mrb[4].mxu1 }
 0x261   : > { %v808_v54 = vrot.slane %v730_v47, 7  ;;  %v732_v55 = vpop.f32.mrb[5].mxu0  ;;  %v2294_v56 = vpop.f32.mrb[5].mxu1  ;;  %v810_v0 = vrot.slane %v801_v48, 7 }
 0x262   : > { %v809_v60 = vrot.slane %v732_v55, 7 }
 0x263   : > { %v814_v57 = vadd.f32 %v808_v54, %v3617_v8  ;;  %v816_v2 = vadd.f32 %v810_v0, %v3623_v28 }
 0x264   : > { %v815_v63 = vadd.f32 %v809_v60, %v3620_v19 }
 0x265   : > { %v2041_v62 = vmul.f32 -1.442695, %v814_v57 }
 0x266   : > { %v2042_v1 = vmul.f32 -1.442695, %v815_v63 }
 0x267   : > { %3064 = vpow2.f32 %v2041_v62 }
 0x268   : > { %3066 = vpow2.f32 %v2042_v1 }
 0x269   : > { %3068 = vtanh.f32 %v816_v2 }
 0x271   : > { %v3065_v6 = vpop.eup %3064 }
 0x272   : > { %v820_v10 = vadd.f32 1.0, %v3065_v6  ;;  %v3067_v11 = vpop.eup %3066 }
 0x273   : > { %v826_v12 = vadd.f32 1.0, %v3067_v11  ;;  %v3069_v13 = vpop.eup %3068 }
 0x274   : > { %3070 = vrcp.f32 %v820_v10 }
 0x275   : > { %3072 = vrcp.f32 %v826_v12 }
 0x27e   : > { %v3071_v16 = vpop.eup %3070 }
 0x27f   : > { %v830_v18 = vmul.f32 %v3071_v16, %v3069_v13  ;;  %v3073_v20 = vpop.eup %3072 }
 0x281   : > { %3074 = vtanh.f32 %v830_v18  ;;  %834 = vst [vmem:[%s3482_s13] sm:$0x2] %v830_v18 }
 0x28b   : > { %v3075_v21 = vpop.eup %3074 }
 0x28c   : > { %v832_v22 = vmul.f32 %v3075_v21, %v3073_v20 }
 0x28e   : > { %833 = vst [vmem:[%s3480_s12] sm:$0x2] %v832_v22  ;;  %v836_v25 = vrot.slane %v832_v22, 1 }
 0x290   : > { %903 = vmatmul.mubr.f32.vlgmr.msra.gmra.mrb[6].mxu0 %v836_v25  ;;  %2328 = vmatmul.mubr.f32.vlgmr.msra.gmra.mrb[6].mxu1 %v836_v25 }
 0x291   : > { %2704 = vmatpush1.bf16.msra.mxu0 %v3498_v50  ;;  %2735 = vmatpush3.bf16.msra.mxu1 %v3496_v49 }
 0x292   : > { %2706 = vmatprep.subr.bf16.mxu0 %v3502_v52  ;;  %2736 = vmatprep.subr.bf16.mxu1 %v3313_v4 }
 0x293   : > { %1076 = vmatprep.mubr.f32.mxu0 %v3314_v9  ;;  %2362 = vmatprep.mubr.msk.f32.mxu1 %vm3315_vm0, %v3314_v9 }
 0x295   : > { %2708 = vmatpush1.bf16.msra.mxu0 %v3508_v59  ;;  %2738 = vmatpush3.bf16.msra.mxu1 %v3506_v58 }
 0x296   : > { %2710 = vmatprep.subr.bf16.mxu0 %v3512_v61  ;;  %2739 = vmatprep.subr.bf16.mxu1 %v3313_v4 }
 0x299   : > { %2712 = vmatpush1.bf16.msra.mxu0 %v3521_v5  ;;  %2741 = vmatpush3.bf16.msra.mxu1 %v3519_v3 }
 0x29a   : > { %2714 = vmatprep.subr.bf16.mxu0 %v3525_v7  ;;  %2742 = vmatprep.subr.bf16.mxu1 %v3313_v4 }
 0x29d   : > { %2716 = vmatpush1.bf16.msra.mxu0 %v3531_v15  ;;  %2744 = vmatpush3.bf16.msra.mxu1 %v3529_v14 }
 0x29e   : > { %2718 = vmatprep.subr.bf16.mxu0 %v3535_v17  ;;  %2745 = vmatprep.subr.bf16.mxu1 %v3313_v4 }
 0x2a1   : > { %2720 = vmatpush1.bf16.msra.mxu0 %v3541_v24  ;;  %2747 = vmatpush3.bf16.msra.mxu1 %v3539_v23 }
 0x2a2   : > { %2722 = vmatprep.subr.bf16.mxu0 %v3545_v26  ;;  %2748 = vmatprep.subr.bf16.mxu1 %v3313_v4 }
 0x2a5   : > { %2724 = vmatpush1.bf16.msra.mxu0 %v3551_v33  ;;  %2750 = vmatpush3.bf16.msra.mxu1 %v3549_v32 }
 0x2a6   : > { %2726 = vmatprep.subr.bf16.mxu0 %v3555_v35  ;;  %2751 = vmatprep.subr.bf16.mxu1 %v3313_v4 }
 0x2a9   : > { %2728 = vmatpush1.bf16.msra.mxu0 %v3561_v43  ;;  %2753 = vmatpush3.bf16.msra.mxu1 %v3559_v41 }
 0x2aa   : > { %2730 = vmatprep.subr.bf16.mxu0 %v3565_v45  ;;  %2754 = vmatprep.subr.bf16.mxu1 %v3313_v4 }
 0x2ad   : > { %2732 = vmatpush1.bf16.msra.mxu0 %v3571_v53  ;;  %2756 = vmatpush3.bf16.msra.mxu1 %v3569_v51 }
 0x2ae   : > { %2758 = vmatprep.subr.bf16.mxu0 %v3493_v42  ;;  %2789 = vmatprep.subr.bf16.mxu1 %v3313_v4 }
 0x363   : > { %v904_v27 = vpop.f32.mrb[6].mxu0  ;;  %v975_v29 = vpop.f32.mrb[6].mxu1 }
 0x364   : > { %v982_v30 = vrot.slane %v904_v27, 6  ;;  %v906_v31 = vpop.f32.mrb[7].mxu0  ;;  %v2329_v34 = vpop.f32.mrb[7].mxu1  ;;  %v984_v40 = vrot.slane %v975_v29, 6 }
 0x365   : > { %v983_v37 = vrot.slane %v906_v31, 6 }
 0x366   : > { %v988_v36 = vadd.f32 %v982_v30, %v3617_v8  ;;  %v990_v46 = vadd.f32 %v984_v40, %v3623_v28 }
 0x367   : > { %v989_v39 = vadd.f32 %v983_v37, %v3620_v19 }
 0x368   : > { %v2043_v38 = vmul.f32 -1.442695, %v988_v36 }
 0x369   : > { %v2044_v44 = vmul.f32 -1.442695, %v989_v39 }
 0x36a   : > { %3076 = vpow2.f32 %v2043_v38 }
 0x36b   : > { %3078 = vpow2.f32 %v2044_v44 }
 0x36c   : > { %3080 = vtanh.f32 %v990_v46 }
 0x374   : > { %v3077_v47 = vpop.eup %3076 }
 0x375   : > { %v994_v48 = vadd.f32 1.0, %v3077_v47  ;;  %v3079_v54 = vpop.eup %3078 }
 0x376   : > { %v1000_v55 = vadd.f32 1.0, %v3079_v54  ;;  %v3081_v56 = vpop.eup %3080 }
 0x377   : > { %3082 = vrcp.f32 %v994_v48 }
 0x378   : > { %3084 = vrcp.f32 %v1000_v55 }
 0x381   : > { %v3083_v57 = vpop.eup %3082 }
 0x382   : > { %v1004_v60 = vmul.f32 %v3083_v57, %v3081_v56  ;;  %v3085_v62 = vpop.eup %3084 }
 0x384   : > { %3086 = vtanh.f32 %v1004_v60  ;;  %1008 = vst [vmem:[%s3482_s13] sm:$0x4] %v1004_v60 }
 0x38e   : > { %v3087_v63 = vpop.eup %3086 }
 0x38f   : > { %v1006_v0 = vmul.f32 %v3087_v63, %v3085_v62 }
 0x391   : > { %1007 = vst [vmem:[%s3480_s12] sm:$0x4] %v1006_v0  ;;  %v1010_v1 = vrot.slane %v1006_v0, 2 }
 0x393   : > { %1077 = vmatmul.mubr.f32.vlgmr.msra.gmra.mrb[8].mxu0 %v1010_v1  ;;  %2363 = vmatmul.mubr.f32.vlgmr.msra.gmra.mrb[8].mxu1 %v1010_v1 }
 0x394   : > { %2760 = vmatpush1.bf16.msra.mxu0 %v3498_v50  ;;  %2791 = vmatpush3.bf16.msra.mxu1 %v3496_v49 }
 0x395   : > { %2762 = vmatprep.subr.bf16.mxu0 %v3502_v52  ;;  %2792 = vmatprep.subr.bf16.mxu1 %v3313_v4 }
 0x396   : > { %1250 = vmatprep.mubr.f32.mxu0 %v3314_v9  ;;  %2397 = vmatprep.mubr.msk.f32.mxu1 %vm3315_vm0, %v3314_v9 }
 0x398   : > { %2764 = vmatpush1.bf16.msra.mxu0 %v3508_v59  ;;  %2794 = vmatpush3.bf16.msra.mxu1 %v3506_v58 }
 0x399   : > { %2766 = vmatprep.subr.bf16.mxu0 %v3512_v61  ;;  %2795 = vmatprep.subr.bf16.mxu1 %v3313_v4 }
 0x39c   : > { %2768 = vmatpush1.bf16.msra.mxu0 %v3521_v5  ;;  %2797 = vmatpush3.bf16.msra.mxu1 %v3519_v3 }
 0x39d   : > { %2770 = vmatprep.subr.bf16.mxu0 %v3525_v7  ;;  %2798 = vmatprep.subr.bf16.mxu1 %v3313_v4 }
 0x3a0   : > { %2772 = vmatpush1.bf16.msra.mxu0 %v3531_v15  ;;  %2800 = vmatpush3.bf16.msra.mxu1 %v3529_v14 }
 0x3a1   : > { %2774 = vmatprep.subr.bf16.mxu0 %v3535_v17  ;;  %2801 = vmatprep.subr.bf16.mxu1 %v3313_v4 }
 0x3a4   : > { %2776 = vmatpush1.bf16.msra.mxu0 %v3541_v24  ;;  %2803 = vmatpush3.bf16.msra.mxu1 %v3539_v23 }
 0x3a5   : > { %2778 = vmatprep.subr.bf16.mxu0 %v3545_v26  ;;  %2804 = vmatprep.subr.bf16.mxu1 %v3313_v4 }
 0x3a8   : > { %2780 = vmatpush1.bf16.msra.mxu0 %v3551_v33  ;;  %2806 = vmatpush3.bf16.msra.mxu1 %v3549_v32 }
 0x3a9   : > { %2782 = vmatprep.subr.bf16.mxu0 %v3555_v35  ;;  %2807 = vmatprep.subr.bf16.mxu1 %v3313_v4 }
 0x3ac   : > { %2784 = vmatpush1.bf16.msra.mxu0 %v3561_v43  ;;  %2809 = vmatpush3.bf16.msra.mxu1 %v3559_v41 }
 0x3ad   : > { %2786 = vmatprep.subr.bf16.mxu0 %v3565_v45  ;;  %2810 = vmatprep.subr.bf16.mxu1 %v3313_v4 }
 0x3b0   : > { %2788 = vmatpush1.bf16.msra.mxu0 %v3571_v53  ;;  %2812 = vmatpush3.bf16.msra.mxu1 %v3569_v51 }
 0x3b1   : > { %2814 = vmatprep.subr.bf16.mxu0 %v3493_v42  ;;  %2845 = vmatprep.subr.bf16.mxu1 %v3313_v4 }
 0x466   : > { %v1078_v2 = vpop.f32.mrb[8].mxu0  ;;  %v1149_v6 = vpop.f32.mrb[8].mxu1 }
 0x467   : > { %v1156_v10 = vrot.slane %v1078_v2, 5  ;;  %v1080_v11 = vpop.f32.mrb[9].mxu0  ;;  %v2364_v12 = vpop.f32.mrb[9].mxu1  ;;  %v1158_v21 = vrot.slane %v1149_v6, 5 }
 0x468   : > { %v1157_v16 = vrot.slane %v1080_v11, 5 }
 0x469   : > { %v1162_v13 = vadd.f32 %v1156_v10, %v3617_v8  ;;  %v1164_v25 = vadd.f32 %v1158_v21, %v3623_v28 }
 0x46a   : > { %v1163_v20 = vadd.f32 %v1157_v16, %v3620_v19 }
 0x46b   : > { %v2045_v18 = vmul.f32 -1.442695, %v1162_v13 }
 0x46c   : > { %v2046_v22 = vmul.f32 -1.442695, %v1163_v20 }
 0x46d   : > { %3088 = vpow2.f32 %v2045_v18 }
 0x46e   : > { %3090 = vpow2.f32 %v2046_v22 }
 0x46f   : > { %3092 = vtanh.f32 %v1164_v25 }
 0x477   : > { %v3089_v27 = vpop.eup %3088 }
 0x478   : > { %v1168_v29 = vadd.f32 1.0, %v3089_v27  ;;  %v3091_v30 = vpop.eup %3090 }
 0x479   : > { %v1174_v31 = vadd.f32 1.0, %v3091_v30  ;;  %v3093_v34 = vpop.eup %3092 }
 0x47a   : > { %3094 = vrcp.f32 %v1168_v29 }
 0x47b   : > { %3096 = vrcp.f32 %v1174_v31 }
 0x484   : > { %v3095_v36 = vpop.eup %3094 }
 0x485   : > { %v1178_v37 = vmul.f32 %v3095_v36, %v3093_v34  ;;  %v3097_v38 = vpop.eup %3096 }
 0x487   : > { %3098 = vtanh.f32 %v1178_v37  ;;  %1182 = vst [vmem:[%s3482_s13] sm:$0x8] %v1178_v37 }
 0x491   : > { %v3099_v39 = vpop.eup %3098 }
 0x492   : > { %v1180_v40 = vmul.f32 %v3099_v39, %v3097_v38 }
 0x494   : > { %1181 = vst [vmem:[%s3480_s12] sm:$0x8] %v1180_v40  ;;  %v1184_v44 = vrot.slane %v1180_v40, 3 }
 0x496   : > { %1251 = vmatmul.mubr.f32.vlgmr.msra.gmra.mrb[10].mxu0 %v1184_v44  ;;  %2398 = vmatmul.mubr.f32.vlgmr.msra.gmra.mrb[10].mxu1 %v1184_v44 }
 0x497   : > { %2816 = vmatpush1.bf16.msra.mxu0 %v3498_v50  ;;  %2847 = vmatpush3.bf16.msra.mxu1 %v3496_v49 }
 0x498   : > { %2818 = vmatprep.subr.bf16.mxu0 %v3502_v52  ;;  %2848 = vmatprep.subr.bf16.mxu1 %v3313_v4 }
 0x499   : > { %1424 = vmatprep.mubr.f32.mxu0 %v3314_v9  ;;  %2432 = vmatprep.mubr.msk.f32.mxu1 %vm3315_vm0, %v3314_v9 }
 0x49b   : > { %2820 = vmatpush1.bf16.msra.mxu0 %v3508_v59  ;;  %2850 = vmatpush3.bf16.msra.mxu1 %v3506_v58 }
 0x49c   : > { %2822 = vmatprep.subr.bf16.mxu0 %v3512_v61  ;;  %2851 = vmatprep.subr.bf16.mxu1 %v3313_v4 }
 0x49f   : > { %2824 = vmatpush1.bf16.msra.mxu0 %v3521_v5  ;;  %2853 = vmatpush3.bf16.msra.mxu1 %v3519_v3 }
 0x4a0   : > { %2826 = vmatprep.subr.bf16.mxu0 %v3525_v7  ;;  %2854 = vmatprep.subr.bf16.mxu1 %v3313_v4 }
 0x4a3   : > { %2828 = vmatpush1.bf16.msra.mxu0 %v3531_v15  ;;  %2856 = vmatpush3.bf16.msra.mxu1 %v3529_v14 }
 0x4a4   : > { %2830 = vmatprep.subr.bf16.mxu0 %v3535_v17  ;;  %2857 = vmatprep.subr.bf16.mxu1 %v3313_v4 }
 0x4a7   : > { %2832 = vmatpush1.bf16.msra.mxu0 %v3541_v24  ;;  %2859 = vmatpush3.bf16.msra.mxu1 %v3539_v23 }
 0x4a8   : > { %2834 = vmatprep.subr.bf16.mxu0 %v3545_v26  ;;  %2860 = vmatprep.subr.bf16.mxu1 %v3313_v4 }
 0x4ab   : > { %2836 = vmatpush1.bf16.msra.mxu0 %v3551_v33  ;;  %2862 = vmatpush3.bf16.msra.mxu1 %v3549_v32 }
 0x4ac   : > { %2838 = vmatprep.subr.bf16.mxu0 %v3555_v35  ;;  %2863 = vmatprep.subr.bf16.mxu1 %v3313_v4 }
 0x4af   : > { %2840 = vmatpush1.bf16.msra.mxu0 %v3561_v43  ;;  %2865 = vmatpush3.bf16.msra.mxu1 %v3559_v41 }
 0x4b0   : > { %2842 = vmatprep.subr.bf16.mxu0 %v3565_v45  ;;  %2866 = vmatprep.subr.bf16.mxu1 %v3313_v4 }
 0x4b3   : > { %2844 = vmatpush1.bf16.msra.mxu0 %v3571_v53  ;;  %2868 = vmatpush3.bf16.msra.mxu1 %v3569_v51 }
 0x4b4   : > { %2870 = vmatprep.subr.bf16.mxu0 %v3493_v42  ;;  %2901 = vmatprep.subr.bf16.mxu1 %v3313_v4 }
 0x569   : > { %v1252_v46 = vpop.f32.mrb[10].mxu0  ;;  %v1323_v47 = vpop.f32.mrb[10].mxu1 }
 0x56a   : > { %v1330_v48 = vrot.slane %v1252_v46, 4  ;;  %v1254_v54 = vpop.f32.mrb[11].mxu0  ;;  %v2399_v55 = vpop.f32.mrb[11].mxu1  ;;  %v1332_v63 = vrot.slane %v1323_v47, 4 }
 0x56b   : > { %v1331_v57 = vrot.slane %v1254_v54, 4 }
 0x56c   : > { %v1336_v56 = vadd.f32 %v1330_v48, %v3617_v8  ;;  %v1338_v1 = vadd.f32 %v1332_v63, %v3623_v28 }
 0x56d   : > { %v1337_v62 = vadd.f32 %v1331_v57, %v3620_v19 }
 0x56e   : > { %v2047_v60 = vmul.f32 -1.442695, %v1336_v56 }
 0x56f   : > { %v2048_v0 = vmul.f32 -1.442695, %v1337_v62 }
 0x570   : > { %3100 = vpow2.f32 %v2047_v60 }
 0x571   : > { %3102 = vpow2.f32 %v2048_v0 }
 0x572   : > { %3104 = vtanh.f32 %v1338_v1 }
 0x57a   : > { %v3101_v2 = vpop.eup %3100 }
 0x57b   : > { %v1342_v6 = vadd.f32 1.0, %v3101_v2  ;;  %v3103_v10 = vpop.eup %3102 }
 0x57c   : > { %v1348_v11 = vadd.f32 1.0, %v3103_v10  ;;  %v3105_v12 = vpop.eup %3104 }
 0x57d   : > { %3106 = vrcp.f32 %v1342_v6 }
 0x57e   : > { %3108 = vrcp.f32 %v1348_v11 }
 0x587   : > { %v3107_v13 = vpop.eup %3106 }
 0x588   : > { %v1352_v16 = vmul.f32 %v3107_v13, %v3105_v12  ;;  %v3109_v18 = vpop.eup %3108 }
 0x58a   : > { %3110 = vtanh.f32 %v1352_v16  ;;  %1356 = vst [vmem:[%s3482_s13] sm:$0x10] %v1352_v16 }
 0x594   : > { %v3111_v20 = vpop.eup %3110 }
 0x595   : > { %v1354_v21 = vmul.f32 %v3111_v20, %v3109_v18 }
 0x597   : > { %1355 = vst [vmem:[%s3480_s12] sm:$0x10] %v1354_v21  ;;  %v1358_v22 = vrot.slane %v1354_v21, 4 }
 0x599   : > { %1425 = vmatmul.mubr.f32.vlgmr.msra.gmra.mrb[12].mxu0 %v1358_v22  ;;  %2433 = vmatmul.mubr.f32.vlgmr.msra.gmra.mrb[12].mxu1 %v1358_v22 }
 0x59a   : > { %2872 = vmatpush1.bf16.msra.mxu0 %v3498_v50  ;;  %2903 = vmatpush3.bf16.msra.mxu1 %v3496_v49 }
 0x59b   : > { %2874 = vmatprep.subr.bf16.mxu0 %v3502_v52  ;;  %2904 = vmatprep.subr.bf16.mxu1 %v3313_v4 }
 0x59c   : > { %1598 = vmatprep.mubr.f32.mxu0 %v3314_v9  ;;  %2467 = vmatprep.mubr.msk.f32.mxu1 %vm3315_vm0, %v3314_v9 }
 0x59e   : > { %2876 = vmatpush1.bf16.msra.mxu0 %v3508_v59  ;;  %2906 = vmatpush3.bf16.msra.mxu1 %v3506_v58 }
 0x59f   : > { %2878 = vmatprep.subr.bf16.mxu0 %v3512_v61  ;;  %2907 = vmatprep.subr.bf16.mxu1 %v3313_v4 }
 0x5a2   : > { %2880 = vmatpush1.bf16.msra.mxu0 %v3521_v5  ;;  %2909 = vmatpush3.bf16.msra.mxu1 %v3519_v3 }
 0x5a3   : > { %2882 = vmatprep.subr.bf16.mxu0 %v3525_v7  ;;  %2910 = vmatprep.subr.bf16.mxu1 %v3313_v4 }
 0x5a6   : > { %2884 = vmatpush1.bf16.msra.mxu0 %v3531_v15  ;;  %2912 = vmatpush3.bf16.msra.mxu1 %v3529_v14 }
 0x5a7   : > { %2886 = vmatprep.subr.bf16.mxu0 %v3535_v17  ;;  %2913 = vmatprep.subr.bf16.mxu1 %v3313_v4 }
 0x5aa   : > { %2888 = vmatpush1.bf16.msra.mxu0 %v3541_v24  ;;  %2915 = vmatpush3.bf16.msra.mxu1 %v3539_v23 }
 0x5ab   : > { %2890 = vmatprep.subr.bf16.mxu0 %v3545_v26  ;;  %2916 = vmatprep.subr.bf16.mxu1 %v3313_v4 }
 0x5ae   : > { %2892 = vmatpush1.bf16.msra.mxu0 %v3551_v33  ;;  %2918 = vmatpush3.bf16.msra.mxu1 %v3549_v32 }
 0x5af   : > { %2894 = vmatprep.subr.bf16.mxu0 %v3555_v35  ;;  %2919 = vmatprep.subr.bf16.mxu1 %v3313_v4 }
 0x5b2   : > { %2896 = vmatpush1.bf16.msra.mxu0 %v3561_v43  ;;  %2921 = vmatpush3.bf16.msra.mxu1 %v3559_v41 }
 0x5b3   : > { %2898 = vmatprep.subr.bf16.mxu0 %v3565_v45  ;;  %2922 = vmatprep.subr.bf16.mxu1 %v3313_v4 }
 0x5b6   : > { %2900 = vmatpush1.bf16.msra.mxu0 %v3571_v53  ;;  %2924 = vmatpush3.bf16.msra.mxu1 %v3569_v51 }
 0x5b7   : > { %2926 = vmatprep.subr.bf16.mxu0 %v3493_v42  ;;  %2957 = vmatprep.subr.bf16.mxu1 %v3313_v4 }
 0x66c   : > { %v1426_v25 = vpop.f32.mrb[12].mxu0  ;;  %v1497_v27 = vpop.f32.mrb[12].mxu1 }
 0x66d   : > { %v1504_v29 = vrot.slane %v1426_v25, 3  ;;  %v1428_v30 = vpop.f32.mrb[13].mxu0  ;;  %v2434_v31 = vpop.f32.mrb[13].mxu1  ;;  %v1506_v39 = vrot.slane %v1497_v27, 3 }
 0x66e   : > { %v1505_v36 = vrot.slane %v1428_v30, 3 }
 0x66f   : > { %v1510_v34 = vadd.f32 %v1504_v29, %v3617_v8  ;;  %v1512_v44 = vadd.f32 %v1506_v39, %v3623_v28 }
 0x670   : > { %v1511_v38 = vadd.f32 %v1505_v36, %v3620_v19 }
 0x671   : > { %v2049_v37 = vmul.f32 -1.442695, %v1510_v34 }
 0x672   : > { %v2050_v40 = vmul.f32 -1.442695, %v1511_v38 }
 0x673   : > { %3112 = vpow2.f32 %v2049_v37 }
 0x674   : > { %3114 = vpow2.f32 %v2050_v40 }
 0x675   : > { %3116 = vtanh.f32 %v1512_v44 }
 0x67d   : > { %v3113_v42 = vpop.eup %3112 }
 0x67e   : > { %v1516_v46 = vadd.f32 1.0, %v3113_v42  ;;  %v3115_v47 = vpop.eup %3114 }
 0x67f   : > { %v1522_v48 = vadd.f32 1.0, %v3115_v47  ;;  %v3117_v54 = vpop.eup %3116 }
 0x680   : > { %3118 = vrcp.f32 %v1516_v46 }
 0x681   : > { %3120 = vrcp.f32 %v1522_v48 }
 0x68a   : > { %v3119_v55 = vpop.eup %3118 }
 0x68b   : > { %v1526_v56 = vmul.f32 %v3119_v55, %v3117_v54  ;;  %v3121_v57 = vpop.eup %3120 }
 0x68d   : > { %3122 = vtanh.f32 %v1526_v56  ;;  %1530 = vst [vmem:[%s3482_s13] sm:$0x20] %v1526_v56 }
 0x697   : > { %v3123_v60 = vpop.eup %3122 }
 0x698   : > { %v1528_v62 = vmul.f32 %v3123_v60, %v3121_v57 }
 0x69a   : > { %1529 = vst [vmem:[%s3480_s12] sm:$0x20] %v1528_v62  ;;  %v1532_v63 = vrot.slane %v1528_v62, 5 }
 0x69c   : > { %1599 = vmatmul.mubr.f32.vlgmr.msra.gmra.mrb[14].mxu0 %v1532_v63  ;;  %2468 = vmatmul.mubr.f32.vlgmr.msra.gmra.mrb[14].mxu1 %v1532_v63 }
 0x69d   : > { %2928 = vmatpush1.bf16.msra.mxu0 %v3498_v50  ;;  %2959 = vmatpush3.bf16.msra.mxu1 %v3496_v49 }
 0x69e   : > { %2930 = vmatprep.subr.bf16.mxu0 %v3502_v52  ;;  %2960 = vmatprep.subr.bf16.mxu1 %v3313_v4 }
 0x69f   : > { %1772 = vmatprep.mubr.f32.mxu0 %v3314_v9  ;;  %2502 = vmatprep.mubr.msk.f32.mxu1 %vm3315_vm0, %v3314_v9 }
 0x6a1   : > { %2932 = vmatpush1.bf16.msra.mxu0 %v3508_v59  ;;  %2962 = vmatpush3.bf16.msra.mxu1 %v3506_v58 }
 0x6a2   : > { %2934 = vmatprep.subr.bf16.mxu0 %v3512_v61  ;;  %2963 = vmatprep.subr.bf16.mxu1 %v3313_v4 }
 0x6a5   : > { %2936 = vmatpush1.bf16.msra.mxu0 %v3521_v5  ;;  %2965 = vmatpush3.bf16.msra.mxu1 %v3519_v3 }
 0x6a6   : > { %2938 = vmatprep.subr.bf16.mxu0 %v3525_v7  ;;  %2966 = vmatprep.subr.bf16.mxu1 %v3313_v4 }
 0x6a9   : > { %2940 = vmatpush1.bf16.msra.mxu0 %v3531_v15  ;;  %2968 = vmatpush3.bf16.msra.mxu1 %v3529_v14 }
 0x6aa   : > { %2942 = vmatprep.subr.bf16.mxu0 %v3535_v17  ;;  %2969 = vmatprep.subr.bf16.mxu1 %v3313_v4 }
 0x6ad   : > { %2944 = vmatpush1.bf16.msra.mxu0 %v3541_v24  ;;  %2971 = vmatpush3.bf16.msra.mxu1 %v3539_v23 }
 0x6ae   : > { %2946 = vmatprep.subr.bf16.mxu0 %v3545_v26  ;;  %2972 = vmatprep.subr.bf16.mxu1 %v3313_v4 }
 0x6b1   : > { %2948 = vmatpush1.bf16.msra.mxu0 %v3551_v33  ;;  %2974 = vmatpush3.bf16.msra.mxu1 %v3549_v32 }
 0x6b2   : > { %2950 = vmatprep.subr.bf16.mxu0 %v3555_v35  ;;  %2975 = vmatprep.subr.bf16.mxu1 %v3313_v4 }
 0x6b5   : > { %2952 = vmatpush1.bf16.msra.mxu0 %v3561_v43  ;;  %2977 = vmatpush3.bf16.msra.mxu1 %v3559_v41 }
 0x6b6   : > { %2954 = vmatprep.subr.bf16.mxu0 %v3565_v45  ;;  %2978 = vmatprep.subr.bf16.mxu1 %v3313_v4 }
 0x6b9   : > { %2956 = vmatpush1.bf16.msra.mxu0 %v3571_v53  ;;  %2980 = vmatpush3.bf16.msra.mxu1 %v3569_v51 }
 0x76f   : > { %v1600_v9 = vpop.f32.mrb[14].mxu0  ;;  %v1671_v49 = vpop.f32.mrb[14].mxu1 }
 0x770   : > { %v1678_v50 = vrot.slane %v1600_v9, 2  ;;  %v1602_v52 = vpop.f32.mrb[15].mxu0  ;;  %v2469_v58 = vpop.f32.mrb[15].mxu1  ;;  %v1680_v7 = vrot.slane %v1671_v49, 2 }
 0x771   : > { %v1679_v61 = vrot.slane %v1602_v52, 2 }
 0x772   : > { %v1684_v59 = vadd.f32 %v1678_v50, %v3617_v8  ;;  %v1686_v4 = vadd.f32 %v1680_v7, %v3623_v28 }
 0x773   : > { %v1685_v5 = vadd.f32 %v1679_v61, %v3620_v19 }
 0x774   : > { %v2051_v3 = vmul.f32 -1.442695, %v1684_v59 }
 0x775   : > { %v2052_v14 = vmul.f32 -1.442695, %v1685_v5 }
 0x776   : > { %3124 = vpow2.f32 %v2051_v3 }
 0x777   : > { %3126 = vpow2.f32 %v2052_v14 }
 0x778   : > { %3128 = vtanh.f32 %v1686_v4 }
 0x780   : > { %v3125_v15 = vpop.eup %3124 }
 0x781   : > { %v1690_v17 = vadd.f32 1.0, %v3125_v15  ;;  %v3127_v23 = vpop.eup %3126 }
 0x782   : > { %v1696_v24 = vadd.f32 1.0, %v3127_v23  ;;  %v3129_v26 = vpop.eup %3128 }
 0x783   : > { %3130 = vrcp.f32 %v1690_v17 }
 0x784   : > { %3132 = vrcp.f32 %v1696_v24 }
 0x78d   : > { %v3131_v32 = vpop.eup %3130 }
 0x78e   : > { %v1700_v33 = vmul.f32 %v3131_v32, %v3129_v26  ;;  %v3133_v35 = vpop.eup %3132 }
 0x790   : > { %3134 = vtanh.f32 %v1700_v33  ;;  %1704 = vst [vmem:[%s3482_s13] sm:$0x40] %v1700_v33 }
 0x79a   : > { %v3135_v41 = vpop.eup %3134 }
 0x79b   : > { %v1702_v43 = vmul.f32 %v3135_v41, %v3133_v35 }
 0x79d   : > { %1703 = vst [vmem:[%s3480_s12] sm:$0x40] %v1702_v43  ;;  %v1706_v45 = vrot.slane %v1702_v43, 6 }
 0x79f   : > { %1773 = vmatmul.mubr.f32.vlgmr.msra.gmra.mrb[16].mxu0 %v1706_v45  ;;  %2503 = vmatmul.mubr.f32.vlgmr.msra.gmra.mrb[16].mxu1 %v1706_v45 }
 0x872   : > { %v1774_v51 = vpop.f32.mrb[16].mxu0  ;;  %v1845_v53 = vpop.f32.mrb[16].mxu1 }
 0x873   : > { %v1852_v0 = vrot.slane %v1774_v51, 1  ;;  %v1776_v1 = vpop.f32.mrb[17].mxu0  ;;  %v2504_v2 = vpop.f32.mrb[17].mxu1  ;;  %v1854_v13 = vrot.slane %v1845_v53, 1 }
 0x874   : > { %v1853_v10 = vrot.slane %v1776_v1, 1 }
 0x875   : > { %v1858_v6 = vadd.f32 %v1852_v0, %v3617_v8  ;;  %v1860_v18 = vadd.f32 %v1854_v13, %v3623_v28 }
 0x876   : > { %v1859_v12 = vadd.f32 %v1853_v10, %v3620_v19 }
 0x877   : > { %v2053_v11 = vmul.f32 -1.442695, %v1858_v6 }
 0x878   : > { %v2054_v16 = vmul.f32 -1.442695, %v1859_v12 }
 0x879   : > { %3136 = vpow2.f32 %v2053_v11 }
 0x87a   : > { %3138 = vpow2.f32 %v2054_v16 }
 0x87b   : > { %3140 = vtanh.f32 %v1860_v18 }
 0x883   : > { %v3137_v20 = vpop.eup %3136 }
 0x884   : > { %v1864_v21 = vadd.f32 1.0, %v3137_v20  ;;  %v3139_v8 = vpop.eup %3138 }
 0x885   : > { %v1870_v22 = vadd.f32 1.0, %v3139_v8  ;;  %v3141_v25 = vpop.eup %3140 }
 0x886   : > { %3142 = vrcp.f32 %v1864_v21 }
 0x887   : > { %3144 = vrcp.f32 %v1870_v22 }
 0x890   : > { %v3143_v27 = vpop.eup %3142 }
 0x891   : > { %v1874_v19 = vmul.f32 %v3143_v27, %v3141_v25 }
 0x893   : > { %3146 = vtanh.f32 %v1874_v19  ;;  %1878 = vst [vmem:[%s3482_s13] sm:$0x80] %v1874_v19 }
 0x894   : > { %3217 = shalt.err (!%p3214_p0)
}
 0x895   : > { %s3218_s11 = scalar_lea.hbm %s3876_s6, 128  ;;  %s3222_s15 = scalar_lea.hbm %s3958_s5, 384 }
 0x896   : > { %p3219_p5 = scmp.ne.s32.totalorder %s3876_s6, %s3218_s11  ;;  %p3223_p9 = scmp.lt.u32.totalorder %s3876_s6, %s3958_s5 }
 0x897   : > { %p3224_p13 = scmp.lt.u32.totalorder %s3222_s15, %s3218_s11  ;;  %p3226_p11 = scmp.lt.u32.totalorder %s3218_s11, %s3876_s6 }
 0x898   : > { %p3220_p1 = pnand %p3219_p5, %p3972_p2 }
 0x899   : > { %p3225_p10 = por %p3224_p13, %p3223_p9 }
 0x89a   : > { %p3221_p6 = pneg %p3220_p1 }
 0x89b   : > { %p3227_p3 = por %p3226_p11, %p3225_p10 }
 0x89d   : > { %p3228_p4 = pnand %p3227_p3, %p3221_p6 }
 0x89f   : > { %3231 = shalt.err (!%p3228_p4)
}
 0x8a0   : > { %2990 = dma.vmem_to_hbm [thread:$0]  (%p3972_p2), %s3878_s17, 128, %s3876_s6, %s1886_s30   ;;  %v3145_v28 = vpop.eup %3144 }
 0x8a1   : > { %s1899_s10 = sshll.u32 %s3480_s12, 4  ;;  %v3147_v29 = vpop.eup %3146  ;;  %s3909_s9 = scalar_lea.hbm %s3957_s4, %s2057_s16  ;;  %s3911_s10 = int_to_ptr.vmem [resolvable:$true] %s1899_s10 }
 0x8a2   : > { %v1876_v30 = vmul.f32 %v3147_v29, %v3145_v28  ;;  %s1881_s11 = scalar_lea.sflag [#allocation5], %s3470_s8  ;;  %s3232_s13 = scalar_lea.vmem %s3911_s10, 128 }
 0x8a3   : > { %p3233_p7 = scmp.ne.s32.totalorder %s3911_s10, %s3232_s13  ;;  %s3317_s17 = smov [#allocation8]  }
 0x8a4   : > { %1877 = vst [vmem:[%s3480_s12] sm:$0x80] %v1876_v30  ;;  %1879 = vst [vmem:[#allocation2 - $0x7] sm:$0x80] %v1876_v30  ;;  %s3236_s22 = sshll.u32 %s3317_s17, 4  ;;  %s3237_s22 = int_to_ptr.vmem [resolvable:$false] %s3236_s22 }
 0x8a5   : > { %p3234_p8 = pnand %p3233_p7, %p3972_p2  ;;  %s3238_s6 = scalar_lea.vmem %s3237_s22, 256 }
 0x8a6   : > { %p3239_p0 = scmp.lt.s32.totalorder %s3911_s10, %s3237_s22  ;;  %p3240_p5 = scmp.lt.s32.totalorder %s3238_s6, %s3232_s13 }
 0x8a7   : > { %p3235_p12 = pneg %p3234_p8 }
 0x8a8   : > { %p3241_p1 = por %p3240_p5, %p3239_p0 }
 0x8aa   : > { %p3242_p6 = pnand %p3241_p1, %p3235_p12 }
 0x8ac   : > { %3245 = shalt.err (!%p3242_p6)
}
 0x8ad   : > { %s3246_s8 = scalar_lea.hbm %s3909_s9, 128  ;;  %s3250_s30 = scalar_lea.hbm %s3957_s4, 384 }
 0x8ae   : > { %p3247_p9 = scmp.ne.s32.totalorder %s3909_s9, %s3246_s8  ;;  %p3251_p11 = scmp.lt.u32.totalorder %s3909_s9, %s3957_s4 }
 0x8af   : > { %p3252_p3 = scmp.lt.u32.totalorder %s3250_s30, %s3246_s8  ;;  %p3254_p7 = scmp.lt.u32.totalorder %s3246_s8, %s3909_s9 }
 0x8b0   : > { %p3248_p13 = pnand %p3247_p9, %p3972_p2 }
 0x8b1   : > { %p3253_p4 = por %p3252_p3, %p3251_p11 }
 0x8b2   : > { %p3249_p10 = pneg %p3248_p13 }
 0x8b3   : > { %p3255_p8 = por %p3254_p7, %p3253_p4 }
 0x8b5   : > { %p3256_p12 = pnand %p3255_p8, %p3249_p10 }
 0x8b7   : > { %3259 = shalt.err (!%p3256_p12)
}
 0x8b8   : > { %2989 = dma.vmem_to_hbm [thread:$0]  (%p3972_p2), %s3911_s10, 128, %s3909_s9, %s1881_s11  }
 0x8b9 PF: > { %p3011_p0 = scmp.ge.s32.totalorder %s3306_s21, 2  ;;  %s1924_s7 = sand.u32 1, %s3294_s18  }
 0x8ba   : > { %p3973_p5 = scmp.ne.s32.totalorder %s3963_s29, 0  ;;  %s1925_s23 = scalar_lea.sflag [#allocation5], %s1924_s7 }
 0x8bc   : > { %p3001_p1 = pnand %p3011_p0, %p3973_p5 }
 0x8be   : > { %3285 = dma.done.wait (!%p3001_p1), %s1925_s23, 128  }
 0x8bf   : > { %3287 = vsyncadd (!%p3001_p1), %s1925_s23, 4294967168  ;;  %s1934_s25 = scalar_lea.sflag [#allocation10], %s1924_s7 }
 0x8c0   : > { %3289 = dma.done.wait (!%p3001_p1), %s1934_s25, 128  }
 0x8c1   : > { %3291 = vsyncadd (!%p3001_p1), %s1934_s25, 4294967168  ;;  %p21_p2 = scmp.ge.s32.totalorder %s3373_s24, 5   ;;  %s3974_s18 = smov %s3298_s19 }
 0x8c2   : > { %s3975_s19 = smov %s3302_s20  ;;  %s3976_s20 = smov %s3384_s27 }
 0x8c3   : > { %s3977_s21 = smov %s3373_s24  ;;  %23 = sbr.rel (!%p21_p2) target bundleno = 7 (0x7), region = 101 }
 0x8ca   :  { %1939 = vsyncpa [#allocation4], 1 }
 0x8cb   :  { %1941 = vsyncpa [#allocation4 + $0x1], 1 }
 0x8cc   :  { %1942 = vsyncpa [#allocation7], 1 }
 0x8cd   :  { %1943 = vsyncpa [#allocation5], 1 }
 0x8ce   :  { %1945 = vsyncpa [#allocation5 + $0x1], 1 }
 0x8cf   :  { %1946 = vsyncpa [#allocation10], 1 }
 0x8d0   :  { %1948 = vsyncpa [#allocation10 + $0x1], 1 }

</bundles_post_ra>
